<compile_context>
chip_gen: v7x
topology: tpu7x:2x2x1
jax: 0.10.0
libtpu: 0.0.40
codegen_flags: <defaults>
</compile_context>

<pallas_src>
import functools

import jax
import jax.numpy as jnp
from jax.experimental import pallas as pl
from jax.experimental.pallas import tpu as pltpu

EPS = 1e-5
MXU_DTYPE = jnp.bfloat16     # conv matmul operand dtype (f32 accumulate on the MXU)
STORE_DTYPE = jnp.bfloat16   # HBM storage dtype for the y1 / y2 intermediates


# ----------------------------- in-kernel helpers -----------------------------

def _im2col_3x3(act, hp, wp, cin):
    """(hp, wp, cin) activation -> (hp*wp, 9*cin) patch for a 3x3 / pad=1 conv.

    Only two single-column sublane-shifted copies (kx = -1 / +1); the ky taps use a
    leading-dim zero pad + leading-dim slices, which are cheap.  Tap order matches
    w_hwio.reshape(9*cin, cout): lane index = ky*3*cin + kx*cin + c.
    """
    dt = act.dtype
    zc = jnp.zeros((hp, 1, cin), dt)
    left = jnp.concatenate([zc, act[:, : wp - 1, :]], axis=1)      # tap at x-1 (kx=0)
    right = jnp.concatenate([act[:, 1:, :], zc], axis=1)           # tap at x+1 (kx=2)
    row = jnp.concatenate([left, act, right], axis=-1)             # (hp, wp, 3*cin)
    zr = jnp.zeros((1, wp, 3 * cin), dt)
    rowp = jnp.concatenate([zr, row, zr], axis=0)                  # (hp+2, wp, 3*cin), leading-dim pad
    patch = jnp.concatenate(
        [rowp[0:hp], rowp[1:hp + 1], rowp[2:hp + 2]], axis=-1)     # (hp, wp, 9*cin), ky outer
    return patch.reshape(hp * wp, 9 * cin)


# ------------------------------- Pallas kernels -------------------------------

def _conv_bn_stats_kernel(x_ref, w_ref, scale_ref, shift_ref,
                          y_ref, s_ref, q_ref, *, hp, wp, cin, pool, apply_bn):
    # x_ref:      pool -> (1, 2*hp, wp, 2*cin)  raw input, column pairs packed on lanes
    #             else -> (1, hp, wp, cin)      previous conv output (STORE_DTYPE)
    # w_ref:      (9*cin, cout)  3x3 weights flattened, MXU_DTYPE
    # scale/shift:(1, cin)       folded BN of the previous stage (used iff apply_bn)
    # y_ref:      (1, hp*wp, cout) raw conv output (STORE_DTYPE)
    # s_ref/q_ref:(1, 1, cout)   per-image channel sum / sum-of-squares (f32)
    x = x_ref[0].astype(jnp.float32)

    if pool:
        # fused 2x2 maxpool: one read of the source, no pooled intermediate in HBM
        hmax = jnp.maximum(x[:, :, :cin], x[:, :, cin:])           # horizontal max
        hmax = hmax.reshape(hp, 2, wp, cin)                        # free leading-dim split
        x = jnp.maximum(hmax[:, 0], hmax[:, 1])                    # vertical max -> (hp, wp, cin)

    if apply_bn:
        # fused BN(prev stage) + ReLU on the input path, kept in f32 (v5e VPU)
        sc = scale_ref[...].reshape(1, 1, cin)
        sh = shift_ref[...].reshape(1, 1, cin)
        x = jnp.maximum(x * sc + sh, 0.0)

    patch = _im2col_3x3(x, hp, wp, cin)                            # (hp*wp, 9*cin) f32

    # bf16 operands cast immediately before the dot; single K=9*cin MXU matmul, f32 acc.
    y = jnp.dot(patch.astype(MXU_DTYPE), w_ref[...],
                preferred_element_type=jnp.float32)                # (hp*wp, cout) f32

    # BN partial statistics from the f32 accumulator (before the storage cast)
    s_ref[0] = jnp.sum(y, axis=0, keepdims=True)
    q_ref[0] = jnp.sum(y * y, axis=0, keepdims=True)
    y_ref[0] = y.astype(y_ref.dtype)


def _bn_relu_kernel(y_ref, scale_ref, shift_ref, o_ref):
    # Lane-dense layout: last dim is wp*cout, so loads/stores are full-width.
    wc = scale_ref.shape[-1]
    sc = scale_ref[...].reshape(1, 1, wc)
    sh = shift_ref[...].reshape(1, 1, wc)
    o_ref[...] = jnp.maximum(y_ref[...].astype(jnp.float32) * sc + sh, 0.0)


# -------------------------------- thin wrappers --------------------------------

def _conv_vmem_limit(*nbytes):
    est = 2 * sum(nbytes) + (4 << 20)          # double buffering + headroom
    return int(min(max(est, 16 << 20), 64 << 20))


def _conv_pass(x_nhwc, w_flat, scale, shift, *, pool, apply_bn):
    b = x_nhwc.shape[0]
    if pool:
        _, h2, wp, cin2 = x_nhwc.shape
        hp, cin = h2 // 2, cin2 // 2
    else:
        _, hp, wp, cin = x_nhwc.shape
    cout = w_flat.shape[-1]
    m = hp * wp

    in_bytes = x_nhwc.shape[1] * x_nhwc.shape[2] * x_nhwc.shape[3] * x_nhwc.dtype.itemsize
    w_bytes = w_flat.size * w_flat.dtype.itemsize
    patch_bytes = m * 9 * cin * 4
    out_bytes = m * cout * (jnp.dtype(STORE_DTYPE).itemsize + 4)

    kernel = functools.partial(_conv_bn_stats_kernel, hp=hp, wp=wp, cin=cin,
                               pool=pool, apply_bn=apply_bn)
    y, s, q = pl.pallas_call(
        kernel,
        grid=(b,),
        in_specs=[
            pl.BlockSpec((1,) + x_nhwc.shape[1:], lambda i: (i, 0, 0, 0)),
            pl.BlockSpec(w_flat.shape, lambda i: (0, 0)),
            pl.BlockSpec((1, cin), lambda i: (0, 0)),
            pl.BlockSpec((1, cin), lambda i: (0, 0)),
        ],
        out_specs=(
            pl.BlockSpec((1, m, cout), lambda i: (i, 0, 0)),
            pl.BlockSpec((1, 1, cout), lambda i: (i, 0, 0)),
            pl.BlockSpec((1, 1, cout), lambda i: (i, 0, 0)),
        ),
        out_shape=(
            jax.ShapeDtypeStruct((b, m, cout), STORE_DTYPE),
            jax.ShapeDtypeStruct((b, 1, cout), jnp.float32),
            jax.ShapeDtypeStruct((b, 1, cout), jnp.float32),
        ),
        compiler_params=pltpu.CompilerParams(
            dimension_semantics=("parallel",),
            vmem_limit_bytes=_conv_vmem_limit(in_bytes, w_bytes, patch_bytes, out_bytes)),
    )(x_nhwc, w_flat, scale, shift)
    return y, s, q


def _bn_relu_apply(y_flat, scale, shift, *, hp, wp, cout):
    # y_flat: (B, hp*wp, cout); viewed lane-dense as (B, hp, wp*cout) (free HBM reshape).
    b = y_flat.shape[0]
    wc = wp * cout
    yl = y_flat.reshape(b, hp, wc)
    scale_t = jnp.tile(scale, (1, wp))             # (1, wp*cout): per-channel -> lane-dense
    shift_t = jnp.tile(shift, (1, wp))
    out = pl.pallas_call(
        _bn_relu_kernel,
        grid=(b,),
        in_specs=[
            pl.BlockSpec((1, hp, wc), lambda i: (i, 0, 0)),
            pl.BlockSpec((1, wc), lambda i: (0, 0)),
            pl.BlockSpec((1, wc), lambda i: (0, 0)),
        ],
        out_specs=pl.BlockSpec((1, hp, wc), lambda i: (i, 0, 0)),
        out_shape=jax.ShapeDtypeStruct((b, hp, wc), jnp.float32),
        compiler_params=pltpu.CompilerParams(dimension_semantics=("parallel",)),
    )(yl, scale_t, shift_t)
    return out.reshape(b, hp, wp, cout)


def _bn_affine(s, q, gamma, beta, m_total):
    # Tiny per-channel math in XLA: fold training-mode BN into (scale, shift).
    # NOTE: E[y^2]-E[y]^2 variance (clamped at 0); fine at unit-scale activations.
    mean = jnp.sum(s, axis=(0, 1)) / m_total
    var = jnp.maximum(jnp.sum(q, axis=(0, 1)) / m_total - mean * mean, 0.0)
    inv = gamma / jnp.sqrt(var + EPS)
    return inv[None, :], (beta - mean * inv)[None, :]


@jax.jit
def down_w_options(x_nchw, w1_hwio, w2_hwio, g1, b1, g2, b2):
    """Forward pass of Down_w_options (bias=False, activation='relu', norm='batch')."""
    b, cin, h, w = x_nchw.shape
    hp, wp = h // 2, w // 2
    m_total = b * hp * wp
    cmid = w1_hwio.shape[-1]
    cout = w2_hwio.shape[-1]

    # NCHW -> NHWC with adjacent column pairs packed on the lane axis (one XLA copy).
    xr = jnp.transpose(x_nchw, (0, 2, 3, 1)).reshape(b, h, wp, 2 * cin)

    w1f = w1_hwio.reshape(9 * cin, cmid).astype(MXU_DTYPE)   # (ky,kx,cin) row-major == tap order
    w2f = w2_hwio.reshape(9 * cmid, cout).astype(MXU_DTYPE)

    dummy_s = jnp.ones((1, cin), jnp.float32)                 # unused (apply_bn=False)
    dummy_h = jnp.zeros((1, cin), jnp.float32)

    # pass 1: fused maxpool(2) + conv1 + per-image BN stats  (single read of x)
    y1, s1, q1 = _conv_pass(xr, w1f, dummy_s, dummy_h, pool=True, apply_bn=False)
    scale1, shift1 = _bn_affine(s1, q1, g1, b1, m_total)

    # pass 2: fused BN1+ReLU (input path) + conv2 + per-image BN stats
    y1s = y1.reshape(b, hp, wp, cmid)                         # free reshape
    y2, s2, q2 = _conv_pass(y1s, w2f, scale1, shift1, pool=False, apply_bn=True)
    scale2, shift2 = _bn_affine(s2, q2, g2, b2, m_total)

    # pass 3: BN2 + ReLU on a lane-dense (hp, wp*cout) view
    a2 = _bn_relu_apply(y2, scale2, shift2, hp=hp, wp=wp, cout=cout)
    return jnp.transpose(a2, (0, 3, 1, 2))                    # NHWC -> NCHW


# ------------------------------ pure-JAX reference ------------------------------

def _reference(x_nchw, w1_hwio, w2_hwio):
    x = jax.lax.reduce_window(x_nchw, -jnp.inf, jax.lax.max,
                              (1, 1, 2, 2), (1, 1, 2, 2), 'VALID')

    def conv(x, w_hwio):
        w_oihw = jnp.transpose(w_hwio, (3, 2, 0, 1))
        return jax.lax.conv_general_dilated(
            x, w_oihw, (1, 1), ((1, 1), (1, 1)),
            dimension_numbers=('NCHW', 'OIHW', 'NCHW'))

    def bn_relu(y):
        mean = y.mean(axis=(0, 2, 3), keepdims=True)
        var = y.var(axis=(0, 2, 3), keepdims=True)
        return jnp.maximum((y - mean) / jnp.sqrt(var + EPS), 0.0)

    y = bn_relu(conv(x, w1_hwio))
    return bn_relu(conv(y, w2_hwio))


# ----------------------------------- main -----------------------------------

if __name__ == "__main__":
    B, Cin, H, W = 2, 4, 16, 16
    Cout = 8
    Cmid = Cout  # DoubleConv default: mid_channels = out_channels

    key = jax.random.PRNGKey(0)
    kx, k1, k2 = jax.random.split(key, 3)
    x = jax.random.normal(kx, (B, Cin, H, W), dtype=jnp.float32)
    w1 = jax.random.normal(k1, (3, 3, Cin, Cmid), dtype=jnp.float32) * 0.1   # HWIO
    w2 = jax.random.normal(k2, (3, 3, Cmid, Cout), dtype=jnp.float32) * 0.1  # HWIO
    g1 = jnp.ones((Cmid,), jnp.float32)   # BatchNorm gamma (PyTorch default init)
    b1 = jnp.zeros((Cmid,), jnp.float32)  # BatchNorm beta
    g2 = jnp.ones((Cout,), jnp.float32)
    b2 = jnp.zeros((Cout,), jnp.float32)

    out = down_w_options(x, w1, w2, g1, b1, g2, b2)
    out = jax.block_until_ready(out)

    ref = _reference(x, w1, w2)
    assert out.shape == (B, Cout, H // 2, W // 2), out.shape
    # f32 path validates at 1e-4; with bf16 MXU operands + bf16 y1/y2 storage the
    # expected end-to-end error is a few 1e-3 on unit-scale outputs.
    low_prec = (MXU_DTYPE != jnp.float32) or (STORE_DTYPE != jnp.float32)
    tol = 5e-2 if low_prec else 1e-4
    assert jnp.allclose(out, ref, rtol=tol, atol=tol), float(jnp.abs(out - ref).max())

    print("KERNEL_OK")
</pallas_src>

<mosaic_0001>
module attributes {stable_mosaic.version = 11 : i64} {
  func.func @_conv_bn_stats_kernel(%arg0: i32, %arg1: memref<1x8x8x8xbf16, #tpu.memory_space<vmem>>, %arg2: memref<72x8xbf16, #tpu.memory_space<vmem>>, %arg3: memref<1x8xf32, #tpu.memory_space<vmem>>, %arg4: memref<1x8xf32, #tpu.memory_space<vmem>>, %arg5: memref<1x64x8xbf16, #tpu.memory_space<vmem>>, %arg6: memref<1x1x8xf32, #tpu.memory_space<vmem>>, %arg7: memref<1x1x8xf32, #tpu.memory_space<vmem>>) attributes {dimension_semantics = [#tpu.dimension_semantics<parallel>], iteration_bounds = array<i64: 2>, scalar_prefetch = 0 : i64, scratch_operands = 0 : i64, tpu.core_type = #tpu.core_type<tc>, window_params = [{transform_indices = @transform_0, window_bounds = array<i64: 1, 8, 8, 8>}, {pipeline_mode = #tpu.pipeline_mode<synchronous>, transform_indices = @transform_1, window_bounds = array<i64: 72, 8>}, {pipeline_mode = #tpu.pipeline_mode<synchronous>, transform_indices = @transform_2, window_bounds = array<i64: 1, 8>}, {pipeline_mode = #tpu.pipeline_mode<synchronous>, transform_indices = @transform_3, window_bounds = array<i64: 1, 8>}, {transform_indices = @transform_4, window_bounds = array<i64: 1, 64, 8>}, {transform_indices = @transform_5, window_bounds = array<i64: 1, 1, 8>}, {transform_indices = @transform_6, window_bounds = array<i64: 1, 1, 8>}]} {
    %c0 = arith.constant 0 : index
    %c0_0 = arith.constant 0 : index
    %c0_1 = arith.constant 0 : index
    %c0_2 = arith.constant 0 : index
    %0 = vector.load %arg1[%c0, %c0_0, %c0_1, %c0_2] : memref<1x8x8x8xbf16, #tpu.memory_space<vmem>>, vector<1x8x8x8xbf16>
    %1 = vector.shape_cast %0 : vector<1x8x8x8xbf16> to vector<8x8x8xbf16>
    %2 = arith.extf %1 : vector<8x8x8xbf16> to vector<8x8x8xf32>
    %c0_3 = arith.constant 0 : index
    %c0_4 = arith.constant 0 : index
    %3 = vector.load %arg3[%c0_3, %c0_4] : memref<1x8xf32, #tpu.memory_space<vmem>>, vector<1x8xf32>
    %4 = vector.shape_cast %3 : vector<1x8xf32> to vector<1x1x8xf32>
    %c0_5 = arith.constant 0 : index
    %c0_6 = arith.constant 0 : index
    %5 = vector.load %arg4[%c0_5, %c0_6] : memref<1x8xf32, #tpu.memory_space<vmem>>, vector<1x8xf32>
    %6 = vector.shape_cast %5 : vector<1x8xf32> to vector<1x1x8xf32>
    %7 = vector.broadcast %4 : vector<1x1x8xf32> to vector<8x8x8xf32>
    %8 = arith.mulf %2, %7 : vector<8x8x8xf32>
    %9 = vector.broadcast %6 : vector<1x1x8xf32> to vector<8x8x8xf32>
    %10 = arith.addf %8, %9 : vector<8x8x8xf32>
    %cst = arith.constant 0.000000e+00 : f32
    %11 = vector.broadcast %cst : f32 to vector<8x8x8xf32>
    %12 = arith.maximumf %10, %11 : vector<8x8x8xf32>
    %cst_7 = arith.constant 0.000000e+00 : f32
    %13 = vector.broadcast %cst_7 : f32 to vector<8x1x8xf32>
    %14 = vector.extract_strided_slice %12 {offsets = [0, 0, 0], sizes = [8, 7, 8], strides = [1, 1, 1]} : vector<8x8x8xf32> to vector<8x7x8xf32>
    %15 = tpu.concatenate %13, %14 in 1 : vector<8x1x8xf32>, vector<8x7x8xf32> -> vector<8x8x8xf32>
    %16 = vector.extract_strided_slice %12 {offsets = [0, 1, 0], sizes = [8, 7, 8], strides = [1, 1, 1]} : vector<8x8x8xf32> to vector<8x7x8xf32>
    %17 = tpu.concatenate %16, %13 in 1 : vector<8x7x8xf32>, vector<8x1x8xf32> -> vector<8x8x8xf32>
    %18 = tpu.concatenate %15, %12, %17 in 2 : vector<8x8x8xf32>, vector<8x8x8xf32>, vector<8x8x8xf32> -> vector<8x8x24xf32>
    %cst_8 = arith.constant 0.000000e+00 : f32
    %19 = vector.broadcast %cst_8 : f32 to vector<1x8x24xf32>
    %20 = tpu.concatenate %19, %18, %19 in 0 : vector<1x8x24xf32>, vector<8x8x24xf32>, vector<1x8x24xf32> -> vector<10x8x24xf32>
    %21 = vector.extract_strided_slice %20 {offsets = [0, 0, 0], sizes = [8, 8, 24], strides = [1, 1, 1]} : vector<10x8x24xf32> to vector<8x8x24xf32>
    %22 = vector.extract_strided_slice %20 {offsets = [1, 0, 0], sizes = [8, 8, 24], strides = [1, 1, 1]} : vector<10x8x24xf32> to vector<8x8x24xf32>
    %23 = vector.extract_strided_slice %20 {offsets = [2, 0, 0], sizes = [8, 8, 24], strides = [1, 1, 1]} : vector<10x8x24xf32> to vector<8x8x24xf32>
    %24 = tpu.concatenate %21, %22, %23 in 2 : vector<8x8x24xf32>, vector<8x8x24xf32>, vector<8x8x24xf32> -> vector<8x8x72xf32>
    %25 = vector.shape_cast %24 : vector<8x8x72xf32> to vector<64x72xf32>
    %26 = arith.truncf %25 : vector<64x72xf32> to vector<64x72xbf16>
    %c0_9 = arith.constant 0 : index
    %c0_10 = arith.constant 0 : index
    %27 = vector.load %arg2[%c0_9, %c0_10] : memref<72x8xbf16, #tpu.memory_space<vmem>>, vector<72x8xbf16>
    %cst_11 = arith.constant dense<0.000000e+00> : vector<64x8xf32>
    %28 = tpu.matmul %26, %27, %cst_11 {dimension_numbers = #tpu.dot_dimension_numbers<[1], [0], [0], [1], [0, 0, 1, 1], [], []>} : vector<64x72xbf16>, vector<72x8xbf16>, vector<64x8xf32> -> vector<64x8xf32>
    %cst_12 = arith.constant dense<0.000000e+00> : vector<8xf32>
    %29 = vector.multi_reduction <add>, %28, %cst_12 [0] : vector<64x8xf32> to vector<8xf32>
    %30 = vector.shape_cast %29 : vector<8xf32> to vector<1x8xf32>
    %c0_13 = arith.constant 0 : index
    %c0_14 = arith.constant 0 : index
    %c0_15 = arith.constant 0 : index
    %31 = vector.load %arg6[%c0_13, %c0_14, %c0_15] : memref<1x1x8xf32, #tpu.memory_space<vmem>>, vector<1x1x8xf32>
    %32 = vector.shape_cast %31 : vector<1x1x8xf32> to vector<1x8xf32>
    %33 = vector.shape_cast %30 : vector<1x8xf32> to vector<1x1x8xf32>
    tpu.vector_store %arg6[%c0_13, %c0_14, %c0_15], %33 {strides = array<i32>} : memref<1x1x8xf32, #tpu.memory_space<vmem>>, vector<1x1x8xf32>,
    %34 = arith.mulf %28, %28 : vector<64x8xf32>
    %cst_16 = arith.constant dense<0.000000e+00> : vector<8xf32>
    %35 = vector.multi_reduction <add>, %34, %cst_16 [0] : vector<64x8xf32> to vector<8xf32>
    %36 = vector.shape_cast %35 : vector<8xf32> to vector<1x8xf32>
    %c0_17 = arith.constant 0 : index
    %c0_18 = arith.constant 0 : index
    %c0_19 = arith.constant 0 : index
    %37 = vector.load %arg7[%c0_17, %c0_18, %c0_19] : memref<1x1x8xf32, #tpu.memory_space<vmem>>, vector<1x1x8xf32>
    %38 = vector.shape_cast %37 : vector<1x1x8xf32> to vector<1x8xf32>
    %39 = vector.shape_cast %36 : vector<1x8xf32> to vector<1x1x8xf32>
    tpu.vector_store %arg7[%c0_17, %c0_18, %c0_19], %39 {strides = array<i32>} : memref<1x1x8xf32, #tpu.memory_space<vmem>>, vector<1x1x8xf32>,
    %40 = arith.truncf %28 : vector<64x8xf32> to vector<64x8xbf16>
    %c0_20 = arith.constant 0 : index
    %c0_21 = arith.constant 0 : index
    %c0_22 = arith.constant 0 : index
    %41 = vector.load %arg5[%c0_20, %c0_21, %c0_22] : memref<1x64x8xbf16, #tpu.memory_space<vmem>>, vector<1x64x8xbf16>
    %42 = vector.shape_cast %41 : vector<1x64x8xbf16> to vector<64x8xbf16>
    %43 = vector.shape_cast %40 : vector<64x8xbf16> to vector<1x64x8xbf16>
    tpu.vector_store %arg5[%c0_20, %c0_21, %c0_22], %43 {strides = array<i32>} : memref<1x64x8xbf16, #tpu.memory_space<vmem>>, vector<1x64x8xbf16>,
    return
  }
  func.func @transform_0(%arg0: i32) -> (i32, i32, i32, i32) {
    %c0_i32 = arith.constant 0 : i32
    %c0_i32_0 = arith.constant 0 : i32
    %c0_i32_1 = arith.constant 0 : i32
    %c0_i32_2 = arith.constant 0 : i32
    return %arg0, %c0_i32, %c0_i32_0, %c0_i32_1 : i32, i32, i32, i32
  }
  func.func @transform_1(%arg0: i32) -> (i32, i32) {
    %c0_i32 = arith.constant 0 : i32
    %c0_i32_0 = arith.constant 0 : i32
    %c0_i32_1 = arith.constant 0 : i32
    return %c0_i32, %c0_i32_0 : i32, i32
  }
  func.func @transform_2(%arg0: i32) -> (i32, i32) {
    %c0_i32 = arith.constant 0 : i32
    %c0_i32_0 = arith.constant 0 : i32
    %c0_i32_1 = arith.constant 0 : i32
    return %c0_i32, %c0_i32_0 : i32, i32
  }
  func.func @transform_3(%arg0: i32) -> (i32, i32) {
    %c0_i32 = arith.constant 0 : i32
    %c0_i32_0 = arith.constant 0 : i32
    %c0_i32_1 = arith.constant 0 : i32
    return %c0_i32, %c0_i32_0 : i32, i32
  }
  func.func @transform_4(%arg0: i32) -> (i32, i32, i32) {
    %c0_i32 = arith.constant 0 : i32
    %c0_i32_0 = arith.constant 0 : i32
    %c0_i32_1 = arith.constant 0 : i32
    return %arg0, %c0_i32, %c0_i32_0 : i32, i32, i32
  }
  func.func @transform_5(%arg0: i32) -> (i32, i32, i32) {
    %c0_i32 = arith.constant 0 : i32
    %c0_i32_0 = arith.constant 0 : i32
    %c0_i32_1 = arith.constant 0 : i32
    return %arg0, %c0_i32, %c0_i32_0 : i32, i32, i32
  }
  func.func @transform_6(%arg0: i32) -> (i32, i32, i32) {
    %c0_i32 = arith.constant 0 : i32
    %c0_i32_0 = arith.constant 0 : i32
    %c0_i32_1 = arith.constant 0 : i32
    return %arg0, %c0_i32, %c0_i32_0 : i32, i32, i32
  }
}

module attributes {stable_mosaic.version = 11 : i64} {
  func.func @_conv_bn_stats_kernel(%arg0: i32, %arg1: memref<1x16x8x8xf32, #tpu.memory_space<vmem>>, %arg2: memref<36x8xbf16, #tpu.memory_space<vmem>>, %arg3: memref<1x4xf32, #tpu.memory_space<vmem>>, %arg4: memref<1x4xf32, #tpu.memory_space<vmem>>, %arg5: memref<1x64x8xbf16, #tpu.memory_space<vmem>>, %arg6: memref<1x1x8xf32, #tpu.memory_space<vmem>>, %arg7: memref<1x1x8xf32, #tpu.memory_space<vmem>>) attributes {dimension_semantics = [#tpu.dimension_semantics<parallel>], iteration_bounds = array<i64: 2>, scalar_prefetch = 0 : i64, scratch_operands = 0 : i64, tpu.core_type = #tpu.core_type<tc>, window_params = [{transform_indices = @transform_0, window_bounds = array<i64: 1, 16, 8, 8>}, {pipeline_mode = #tpu.pipeline_mode<synchronous>, transform_indices = @transform_1, window_bounds = array<i64: 36, 8>}, {pipeline_mode = #tpu.pipeline_mode<synchronous>, transform_indices = @transform_2, window_bounds = array<i64: 1, 4>}, {pipeline_mode = #tpu.pipeline_mode<synchronous>, transform_indices = @transform_3, window_bounds = array<i64: 1, 4>}, {transform_indices = @transform_4, window_bounds = array<i64: 1, 64, 8>}, {transform_indices = @transform_5, window_bounds = array<i64: 1, 1, 8>}, {transform_indices = @transform_6, window_bounds = array<i64: 1, 1, 8>}]} {
    %c0 = arith.constant 0 : index
    %c0_0 = arith.constant 0 : index
    %c0_1 = arith.constant 0 : index
    %c0_2 = arith.constant 0 : index
    %0 = vector.load %arg1[%c0, %c0_0, %c0_1, %c0_2] : memref<1x16x8x8xf32, #tpu.memory_space<vmem>>, vector<1x16x8x8xf32>
    %1 = vector.shape_cast %0 : vector<1x16x8x8xf32> to vector<16x8x8xf32>
    %2 = vector.extract_strided_slice %1 {offsets = [0, 0, 0], sizes = [16, 8, 4], strides = [1, 1, 1]} : vector<16x8x8xf32> to vector<16x8x4xf32>
    %3 = vector.extract_strided_slice %1 {offsets = [0, 0, 4], sizes = [16, 8, 4], strides = [1, 1, 1]} : vector<16x8x8xf32> to vector<16x8x4xf32>
    %4 = arith.maximumf %2, %3 : vector<16x8x4xf32>
    %5 = vector.shape_cast %4 : vector<16x8x4xf32> to vector<8x2x8x4xf32>
    %6 = vector.extract_strided_slice %5 {offsets = [0, 0, 0, 0], sizes = [8, 1, 8, 4], strides = [1, 1, 1, 1]} : vector<8x2x8x4xf32> to vector<8x1x8x4xf32>
    %7 = vector.shape_cast %6 : vector<8x1x8x4xf32> to vector<8x8x4xf32>
    %8 = vector.extract_strided_slice %5 {offsets = [0, 1, 0, 0], sizes = [8, 1, 8, 4], strides = [1, 1, 1, 1]} : vector<8x2x8x4xf32> to vector<8x1x8x4xf32>
    %9 = vector.shape_cast %8 : vector<8x1x8x4xf32> to vector<8x8x4xf32>
    %10 = arith.maximumf %7, %9 : vector<8x8x4xf32>
    %cst = arith.constant 0.000000e+00 : f32
    %11 = vector.broadcast %cst : f32 to vector<8x1x4xf32>
    %12 = vector.extract_strided_slice %10 {offsets = [0, 0, 0], sizes = [8, 7, 4], strides = [1, 1, 1]} : vector<8x8x4xf32> to vector<8x7x4xf32>
    %13 = tpu.concatenate %11, %12 in 1 : vector<8x1x4xf32>, vector<8x7x4xf32> -> vector<8x8x4xf32>
    %14 = vector.extract_strided_slice %10 {offsets = [0, 1, 0], sizes = [8, 7, 4], strides = [1, 1, 1]} : vector<8x8x4xf32> to vector<8x7x4xf32>
    %15 = tpu.concatenate %14, %11 in 1 : vector<8x7x4xf32>, vector<8x1x4xf32> -> vector<8x8x4xf32>
    %16 = tpu.concatenate %13, %10, %15 in 2 : vector<8x8x4xf32>, vector<8x8x4xf32>, vector<8x8x4xf32> -> vector<8x8x12xf32>
    %cst_3 = arith.constant 0.000000e+00 : f32
    %17 = vector.broadcast %cst_3 : f32 to vector<1x8x12xf32>
    %18 = tpu.concatenate %17, %16, %17 in 0 : vector<1x8x12xf32>, vector<8x8x12xf32>, vector<1x8x12xf32> -> vector<10x8x12xf32>
    %19 = vector.extract_strided_slice %18 {offsets = [0, 0, 0], sizes = [8, 8, 12], strides = [1, 1, 1]} : vector<10x8x12xf32> to vector<8x8x12xf32>
    %20 = vector.extract_strided_slice %18 {offsets = [1, 0, 0], sizes = [8, 8, 12], strides = [1, 1, 1]} : vector<10x8x12xf32> to vector<8x8x12xf32>
    %21 = vector.extract_strided_slice %18 {offsets = [2, 0, 0], sizes = [8, 8, 12], strides = [1, 1, 1]} : vector<10x8x12xf32> to vector<8x8x12xf32>
    %22 = tpu.concatenate %19, %20, %21 in 2 : vector<8x8x12xf32>, vector<8x8x12xf32>, vector<8x8x12xf32> -> vector<8x8x36xf32>
    %23 = vector.shape_cast %22 : vector<8x8x36xf32> to vector<64x36xf32>
    %24 = arith.truncf %23 : vector<64x36xf32> to vector<64x36xbf16>
    %c0_4 = arith.constant 0 : index
    %c0_5 = arith.constant 0 : index
    %25 = vector.load %arg2[%c0_4, %c0_5] : memref<36x8xbf16, #tpu.memory_space<vmem>>, vector<36x8xbf16>
    %cst_6 = arith.constant dense<0.000000e+00> : vector<64x8xf32>
    %26 = tpu.matmul %24, %25, %cst_6 {dimension_numbers = #tpu.dot_dimension_numbers<[1], [0], [0], [1], [0, 0, 1, 1], [], []>} : vector<64x36xbf16>, vector<36x8xbf16>, vector<64x8xf32> -> vector<64x8xf32>
    %cst_7 = arith.constant dense<0.000000e+00> : vector<8xf32>
    %27 = vector.multi_reduction <add>, %26, %cst_7 [0] : vector<64x8xf32> to vector<8xf32>
    %28 = vector.shape_cast %27 : vector<8xf32> to vector<1x8xf32>
    %c0_8 = arith.constant 0 : index
    %c0_9 = arith.constant 0 : index
    %c0_10 = arith.constant 0 : index
    %29 = vector.load %arg6[%c0_8, %c0_9, %c0_10] : memref<1x1x8xf32, #tpu.memory_space<vmem>>, vector<1x1x8xf32>
    %30 = vector.shape_cast %29 : vector<1x1x8xf32> to vector<1x8xf32>
    %31 = vector.shape_cast %28 : vector<1x8xf32> to vector<1x1x8xf32>
    tpu.vector_store %arg6[%c0_8, %c0_9, %c0_10], %31 {strides = array<i32>} : memref<1x1x8xf32, #tpu.memory_space<vmem>>, vector<1x1x8xf32>,
    %32 = arith.mulf %26, %26 : vector<64x8xf32>
    %cst_11 = arith.constant dense<0.000000e+00> : vector<8xf32>
    %33 = vector.multi_reduction <add>, %32, %cst_11 [0] : vector<64x8xf32> to vector<8xf32>
    %34 = vector.shape_cast %33 : vector<8xf32> to vector<1x8xf32>
    %c0_12 = arith.constant 0 : index
    %c0_13 = arith.constant 0 : index
    %c0_14 = arith.constant 0 : index
    %35 = vector.load %arg7[%c0_12, %c0_13, %c0_14] : memref<1x1x8xf32, #tpu.memory_space<vmem>>, vector<1x1x8xf32>
    %36 = vector.shape_cast %35 : vector<1x1x8xf32> to vector<1x8xf32>
    %37 = vector.shape_cast %34 : vector<1x8xf32> to vector<1x1x8xf32>
    tpu.vector_store %arg7[%c0_12, %c0_13, %c0_14], %37 {strides = array<i32>} : memref<1x1x8xf32, #tpu.memory_space<vmem>>, vector<1x1x8xf32>,
    %38 = arith.truncf %26 : vector<64x8xf32> to vector<64x8xbf16>
    %c0_15 = arith.constant 0 : index
    %c0_16 = arith.constant 0 : index
    %c0_17 = arith.constant 0 : index
    %39 = vector.load %arg5[%c0_15, %c0_16, %c0_17] : memref<1x64x8xbf16, #tpu.memory_space<vmem>>, vector<1x64x8xbf16>
    %40 = vector.shape_cast %39 : vector<1x64x8xbf16> to vector<64x8xbf16>
    %41 = vector.shape_cast %38 : vector<64x8xbf16> to vector<1x64x8xbf16>
    tpu.vector_store %arg5[%c0_15, %c0_16, %c0_17], %41 {strides = array<i32>} : memref<1x64x8xbf16, #tpu.memory_space<vmem>>, vector<1x64x8xbf16>,
    return
  }
  func.func @transform_0(%arg0: i32) -> (i32, i32, i32, i32) {
    %c0_i32 = arith.constant 0 : i32
    %c0_i32_0 = arith.constant 0 : i32
    %c0_i32_1 = arith.constant 0 : i32
    %c0_i32_2 = arith.constant 0 : i32
    return %arg0, %c0_i32, %c0_i32_0, %c0_i32_1 : i32, i32, i32, i32
  }
  func.func @transform_1(%arg0: i32) -> (i32, i32) {
    %c0_i32 = arith.constant 0 : i32
    %c0_i32_0 = arith.constant 0 : i32
    %c0_i32_1 = arith.constant 0 : i32
    return %c0_i32, %c0_i32_0 : i32, i32
  }
  func.func @transform_2(%arg0: i32) -> (i32, i32) {
    %c0_i32 = arith.constant 0 : i32
    %c0_i32_0 = arith.constant 0 : i32
    %c0_i32_1 = arith.constant 0 : i32
    return %c0_i32, %c0_i32_0 : i32, i32
  }
  func.func @transform_3(%arg0: i32) -> (i32, i32) {
    %c0_i32 = arith.constant 0 : i32
    %c0_i32_0 = arith.constant 0 : i32
    %c0_i32_1 = arith.constant 0 : i32
    return %c0_i32, %c0_i32_0 : i32, i32
  }
  func.func @transform_4(%arg0: i32) -> (i32, i32, i32) {
    %c0_i32 = arith.constant 0 : i32
    %c0_i32_0 = arith.constant 0 : i32
    %c0_i32_1 = arith.constant 0 : i32
    return %arg0, %c0_i32, %c0_i32_0 : i32, i32, i32
  }
  func.func @transform_5(%arg0: i32) -> (i32, i32, i32) {
    %c0_i32 = arith.constant 0 : i32
    %c0_i32_0 = arith.constant 0 : i32
    %c0_i32_1 = arith.constant 0 : i32
    return %arg0, %c0_i32, %c0_i32_0 : i32, i32, i32
  }
  func.func @transform_6(%arg0: i32) -> (i32, i32, i32) {
    %c0_i32 = arith.constant 0 : i32
    %c0_i32_0 = arith.constant 0 : i32
    %c0_i32_1 = arith.constant 0 : i32
    return %arg0, %c0_i32, %c0_i32_0 : i32, i32, i32
  }
}

module attributes {stable_mosaic.version = 11 : i64} {
  func.func @_bn_relu_kernel(%arg0: i32, %arg1: memref<1x8x64xbf16, #tpu.memory_space<vmem>>, %arg2: memref<1x64xf32, #tpu.memory_space<vmem>>, %arg3: memref<1x64xf32, #tpu.memory_space<vmem>>, %arg4: memref<1x8x64xf32, #tpu.memory_space<vmem>>) attributes {dimension_semantics = [#tpu.dimension_semantics<parallel>], iteration_bounds = array<i64: 2>, scalar_prefetch = 0 : i64, scratch_operands = 0 : i64, tpu.core_type = #tpu.core_type<tc>, window_params = [{transform_indices = @transform_0, window_bounds = array<i64: 1, 8, 64>}, {pipeline_mode = #tpu.pipeline_mode<synchronous>, transform_indices = @transform_1, window_bounds = array<i64: 1, 64>}, {pipeline_mode = #tpu.pipeline_mode<synchronous>, transform_indices = @transform_2, window_bounds = array<i64: 1, 64>}, {transform_indices = @transform_3, window_bounds = array<i64: 1, 8, 64>}]} {
    %c0 = arith.constant 0 : index
    %c0_0 = arith.constant 0 : index
    %0 = vector.load %arg2[%c0, %c0_0] : memref<1x64xf32, #tpu.memory_space<vmem>>, vector<1x64xf32>
    %1 = vector.shape_cast %0 : vector<1x64xf32> to vector<1x1x64xf32>
    %c0_1 = arith.constant 0 : index
    %c0_2 = arith.constant 0 : index
    %2 = vector.load %arg3[%c0_1, %c0_2] : memref<1x64xf32, #tpu.memory_space<vmem>>, vector<1x64xf32>
    %3 = vector.shape_cast %2 : vector<1x64xf32> to vector<1x1x64xf32>
    %c0_3 = arith.constant 0 : index
    %c0_4 = arith.constant 0 : index
    %c0_5 = arith.constant 0 : index
    %4 = vector.load %arg1[%c0_3, %c0_4, %c0_5] : memref<1x8x64xbf16, #tpu.memory_space<vmem>>, vector<1x8x64xbf16>
    %5 = arith.extf %4 : vector<1x8x64xbf16> to vector<1x8x64xf32>
    %6 = vector.broadcast %1 : vector<1x1x64xf32> to vector<1x8x64xf32>
    %7 = arith.mulf %5, %6 : vector<1x8x64xf32>
    %8 = vector.broadcast %3 : vector<1x1x64xf32> to vector<1x8x64xf32>
    %9 = arith.addf %7, %8 : vector<1x8x64xf32>
    %cst = arith.constant 0.000000e+00 : f32
    %10 = vector.broadcast %cst : f32 to vector<1x8x64xf32>
    %11 = arith.maximumf %9, %10 : vector<1x8x64xf32>
    %c0_6 = arith.constant 0 : index
    %c0_7 = arith.constant 0 : index
    %c0_8 = arith.constant 0 : index
    %12 = vector.load %arg4[%c0_6, %c0_7, %c0_8] : memref<1x8x64xf32, #tpu.memory_space<vmem>>, vector<1x8x64xf32>
    tpu.vector_store %arg4[%c0_6, %c0_7, %c0_8], %11 {strides = array<i32>} : memref<1x8x64xf32, #tpu.memory_space<vmem>>, vector<1x8x64xf32>,
    return
  }
  func.func @transform_0(%arg0: i32) -> (i32, i32, i32) {
    %c0_i32 = arith.constant 0 : i32
    %c0_i32_0 = arith.constant 0 : i32
    %c0_i32_1 = arith.constant 0 : i32
    return %arg0, %c0_i32, %c0_i32_0 : i32, i32, i32
  }
  func.func @transform_1(%arg0: i32) -> (i32, i32) {
    %c0_i32 = arith.constant 0 : i32
    %c0_i32_0 = arith.constant 0 : i32
    %c0_i32_1 = arith.constant 0 : i32
    return %c0_i32, %c0_i32_0 : i32, i32
  }
  func.func @transform_2(%arg0: i32) -> (i32, i32) {
    %c0_i32 = arith.constant 0 : i32
    %c0_i32_0 = arith.constant 0 : i32
    %c0_i32_1 = arith.constant 0 : i32
    return %c0_i32, %c0_i32_0 : i32, i32
  }
  func.func @transform_3(%arg0: i32) -> (i32, i32, i32) {
    %c0_i32 = arith.constant 0 : i32
    %c0_i32_0 = arith.constant 0 : i32
    %c0_i32_1 = arith.constant 0 : i32
    return %arg0, %c0_i32, %c0_i32_0 : i32, i32, i32
  }
}

</mosaic_0001>

<bundles_post_ra>
// kernel: down_w_options.5
= control target key start
LH: loop header
LB: loop body
LE: loop exit
PB: predicated region body
PF: predicated region fallthrough
CT: control target
= control target key end

     0   :  { %s263_s12 = smov 0   ;;  %s299_s0 = inlined_call_operand.vmem [shape: bf16[2,8,64], index: 0, kind: input, shape index: {}]   ;;  %s300_s1 = inlined_call_operand.vmem [shape: f32[1,64], index: 1, kind: input, shape index: {}]   ;;  %s301_s2 = inlined_call_operand.vmem [shape: f32[1,64], index: 2, kind: input, shape index: {}]   ;;  %s302_s3 = inlined_call_operand.vmem [shape: f32[2,8,64], index: 3, kind: output, shape index: {}]  }
   0x1 LB: > { %s240_s13 = sadd.s32 4294967295, %s265_s12   ;;  %p244_p0 = scmp.ge.s32.totalorder %s265_s12, 1  ;;  %s265_s12 = sphi %s263_s12, %s13_s12  }
   0x2   : > { %p136_p1 = scmp.lt.s32.totalorder %s265_s12, 3 }
   0x4   : > { %p137_p2 = pnand %p244_p0, %p136_p1 }
   0x5   : > { %p158_p3 = scmp.lt.s32.totalorder (!%p137_p2), %s240_s13, 1  ;;  %v247_v0 = vld [vmem:[%s300_s1] ss:$0 sm:$0xff] (!%p137_p2)  ;;  %vm185_vm0 = vcmask (!%p137_p2), 523264  }
   0x6   : > { %140 = sbr.rel (%p137_p2) target bundleno = 26 (0x1a), region = 32  ;;  %v248_v3 = vld [vmem:[%s301_s2] ss:$0 sm:$0xff] (!%p137_p2) }
   0xd   : > { %s304_s13 = smov (!%p158_p3, %s240_s13), 1 }
   0xe   : > { %s245_s14 = sshll.u32 %s304_s13, 2  ;;  %s246_s22 = sshll.u32 %s304_s13, 3 }
   0xf   : > { %s161_s17 = scalar_lea.vmem %s299_s0, %s245_s14  ;;  %s165_s25 = scalar_lea.vmem %s302_s3, %s246_s22 }
  0x10   : > { %v168_v1 = vld [vmem:[%s161_s17] sm:$0xf] }
  0x11   : > { %v169_v2 = vunpack.c.l.bf16 %v168_v1 }
  0x13   : > { %v176_v4 = vmul.f32 %v247_v0, %v169_v2 }
  0x15   : > { %v183_v5 = vadd.f32 %v248_v3, %v176_v4 }
  0x17   : > { %v184_v6 = vmax.f32 %v183_v5, 0.0 }
  0x19   : > { %186 = vst.msk [vmem:[%s165_s25] sm:$0xff] %vm185_vm0, %v184_v6 }
  0x1a PF: > { %s13_s12 = sadd.s32 1, %s265_s12  }
  0x1b   : > { %p10_p4 = scmp.ge.s32.totalorder %s13_s12, 4  }
  0x1d   :  { %12 = sbr.rel (!%p10_p4) target bundleno = 1 (0x1), region = 62 }

// kernel: down_w_options.3
= control target key start
LH: loop header
LB: loop body
LE: loop exit
PB: predicated region body
PF: predicated region fallthrough
CT: control target
= control target key end

     0   :  { %s1132_s21 = smov 0   ;;  %s1333_s0 = inlined_call_operand.vmem [shape: f32[2,16,8,8], index: 0, kind: input, shape index: {}]   ;;  %s1334_s1 = inlined_call_operand.vmem [shape: bf16[36,8], index: 1, kind: input, shape index: {}]   ;;  %s1335_s2 = inlined_call_operand.vmem [shape: f32[1,4], index: 2, kind: input, shape index: {}]   ;;  %s1336_s3 = inlined_call_operand.vmem [shape: f32[1,4], index: 3, kind: input, shape index: {}]   ;;  %s1337_s4 = inlined_call_operand.vmem [shape: bf16[2,64,8], index: 4, kind: output, shape index: {0}]   ;;  %s1338_s5 = inlined_call_operand.vmem [shape: f32[2,1,8], index: 5, kind: output, shape index: {1}]   ;;  %s1339_s6 = inlined_call_operand.vmem [shape: f32[2,1,8], index: 6, kind: output, shape index: {2}]  }
   0x1 LB: > { %s886_s2 = sadd.s32 4294967295, %s1089_s21   ;;  %p890_p0 = scmp.ge.s32.totalorder %s1089_s21, 1  ;;  %s1089_s21 = sphi %s1132_s21, %s17_s21  }
   0x2   : > { %p217_p1 = scmp.lt.s32.totalorder %s1089_s21, 3 }
   0x4   : > { %p218_p2 = pnand %p890_p0, %p217_p1 }
   0x5   : > { %p253_p3 = scmp.lt.s32.totalorder (!%p218_p2), %s886_s2, 1  ;;  %s1091_s25 = smov (!%p218_p2), 124   ;;  %vm423_vm0 = vcmask (!%p218_p2), 1046528   ;;  %vm398_vm1 = vcmask (!%p218_p2), 1040384   ;;  %vm488_vm2 = vcmask (!%p218_p2), 31744   ;;  %vm497_vm3 = vcmask (!%p218_p2), 64512  }
   0x6   : > { %221 = sbr.rel (%p218_p2) target bundleno = 644 (0x284), region = 36  ;;  %s1092_s26 = smov (!%p218_p2), 4   ;;  %vm618_vm4 = vcmask (!%p218_p2), 1041408   ;;  %vm563_vm5 = vcmask (!%p218_p2), 97280   ;;  %vm572_vm6 = vcmask (!%p218_p2), 195584   ;;  %vm605_vm7 = vcmask (!%p218_p2), 293888  }
   0x7   : > { %s1093_s27 = smov (!%p218_p2), 8   ;;  %s1094_s10 = smov (!%p218_p2), 12   ;;  %vm772_vm8 = vcmask (!%p218_p2), 60416   ;;  %vm708_vm9 = vcmask (!%p218_p2), 57344  }
   0x8   : > { %s1095_s11 = smov (!%p218_p2), 24  }
   0xd   : > { %s1341_s2 = smov (!%p253_p3, %s886_s2), 1 }
   0xe   : > { %s912_s3 = sshll.u32 %s1341_s2, 7  ;;  %s913_s12 = sshll.u32 %s1341_s2, 5 }
   0xf   : > { %s257_s24 = scalar_lea.vmem %s1333_s0, %s912_s3  ;;  %s1288_s15 = scalar_lea.vmem %s1337_s4, %s913_s12 }
  0x10   : > { %v274_v0 = vld [vmem:[%s257_s24 + $0x20] sm:$0xff]  ;;  %v275_v1 = vld [vmem:[%s257_s24 + $0x28] sm:$0xff]  ;;  %v276_v5 = vld [vmem:[%s257_s24 + $0x30] sm:$0xff]  ;;  %s265_s18 = scalar_lea.vmem %s1338_s5, %s1341_s2  ;;  %s268_s3 = scalar_lea.vmem %s1339_s6, %s1341_s2 }
  0x11   : > { %v270_v2 = vld [vmem:[%s257_s24] sm:$0xff]  ;;  %v975_v3 = vpack.i.bf16 %v275_v1, %v274_v0  ;;  %v271_v4 = vld [vmem:[%s257_s24 + $0x8] sm:$0xff]  ;;  %v277_v6 = vld [vmem:[%s257_s24 + $0x38] sm:$0xff] }
  0x12   : > { %v965_v7 = vpack.i.bf16 %v271_v4, %v270_v2  ;;  %v272_v8 = vld [vmem:[%s257_s24 + $0x10] sm:$0xff]  ;;  %v273_v9 = vld [vmem:[%s257_s24 + $0x18] sm:$0xff]  ;;  %v980_v10 = vpack.i.bf16 %v277_v6, %v276_v5  ;;  %v278_v14 = vld [vmem:[%s257_s24 + $0x40] sm:$0xff] }
  0x13   : > { %976 = vrot.lane.b32.xlu1 %v975_v3, %s1091_s25  ;;  %v970_v11 = vpack.i.bf16 %v273_v9, %v272_v8  ;;  %v280_v12 = vld [vmem:[%s257_s24 + $0x50] sm:$0xff]  ;;  %v281_v13 = vld [vmem:[%s257_s24 + $0x58] sm:$0xff]  ;;  %v279_v15 = vld [vmem:[%s257_s24 + $0x48] sm:$0xff] }
  0x14   : > { %966 = vrot.lane.b32.xlu0 %v965_v7, %s1091_s25  ;;  %v990_v16 = vpack.i.bf16 %v281_v13, %v280_v12  ;;  %v985_v17 = vpack.i.bf16 %v279_v15, %v278_v14  ;;  %v1146_v18 = vld [vmem:[%s257_s24 + $0x70] sm:$0xff]  ;;  %v285_v19 = vld [vmem:[%s257_s24 + $0x78] sm:$0xff]  ;;  %v1148_v20 = vld [vmem:[%s257_s24 + $0x60] sm:$0xff] }
  0x15   : > { %v1150_v21 = vld [vmem:[%s257_s24 + $0x68] sm:$0xff]  ;;  %v1000_v22 = vpack.i.bf16 %v285_v19, %v1146_v18 }
  0x16   : > { %v995_v23 = vpack.i.bf16 %v1150_v21, %v1148_v20 }
  0x17   : > { %981 = vrot.lane.b32.xlu1 %v980_v10, %s1091_s25 }
  0x18   : > { %971 = vrot.lane.b32.xlu0 %v970_v11, %s1091_s25 }
  0x1b   : > { %991 = vrot.lane.b32.xlu1 %v990_v16, %s1091_s25 }
  0x1c   : > { %986 = vrot.lane.b32.xlu0 %v985_v17, %s1091_s25 }
  0x1f   : > { %1001 = vrot.lane.b32.xlu1 %v1000_v22, %s1091_s25 }
  0x20   : > { %996 = vrot.lane.b32.xlu0 %v995_v23, %s1091_s25 }
  0x85   : > { %v977_v24 = vpop.permute.xlu1 %976 }
  0x86   : > { %v979_v25 = vunpack.i.h.bf16 %v977_v24  ;;  %v978_v26 = vunpack.i.l.bf16 %v977_v24  ;;  %v967_v27 = vpop.permute.xlu0 %966 }
  0x87   : > { %v969_v28 = vunpack.i.h.bf16 %v967_v27  ;;  %v968_v29 = vunpack.i.l.bf16 %v967_v27 }
  0x88   : > { %v355_v30 = vmax.f32 %v275_v1, %v979_v25  ;;  %v354_v31 = vmax.f32 %v274_v0, %v978_v26 }
  0x89   : > { %v351_v32 = vmax.f32 %v271_v4, %v969_v28  ;;  %v350_v33 = vmax.f32 %v270_v2, %v968_v29  ;;  %v982_v34 = vpop.permute.xlu1 %981 }
  0x8a   : > { %v984_v35 = vunpack.i.h.bf16 %v982_v34  ;;  %v983_v36 = vunpack.i.l.bf16 %v982_v34  ;;  %v972_v37 = vpop.permute.xlu0 %971  ;;  %v1155_v40 = vmax.f32 %v354_v31, %v355_v30 }
  0x8b   : > { %v974_v38 = vunpack.i.h.bf16 %v972_v37  ;;  %v973_v39 = vunpack.i.l.bf16 %v972_v37  ;;  %v1157_v41 = vmax.f32 %v350_v33, %v351_v32  ;;  %v1080_v32 = vld [vmem:[%s1334_s1] sm:$0xff]  }
  0x8c   : > { %v357_v42 = vmax.f32 %v277_v6, %v984_v35  ;;  %v356_v43 = vmax.f32 %v276_v5, %v983_v36  ;;  %v409_v62 = vrot.slane %v1155_v40, 1  ;;  %929 = vmatprep.subr.bf16.mxu0 %v1080_v32  ;;  %943 = vmatprep.subr.bf16.mxu1 %v1080_v32 }
  0x8d   : > { %v353_v44 = vmax.f32 %v273_v9, %v974_v38  ;;  %v352_v45 = vmax.f32 %v272_v8, %v973_v39  ;;  %v992_v46 = vpop.permute.xlu1 %991  ;;  %v407_v57 = vrot.slane %v1157_v41, 1  ;;  %v382_v34 = vrot.slane %v1157_v41, 7  ;;  %930 = vmatpush3.bf16.msra.mxu0 %v1080_v32  ;;  %946 = vmatpush3.bf16.msra.mxu1 %v1080_v32  ;;  %v1081_v39 = vld [vmem:[%s1334_s1 + $0x8] sm:$0xff]  }
  0x8e   : > { %v1159_v47 = vmax.f32 %v356_v43, %v357_v42  ;;  %v994_v48 = vunpack.i.h.bf16 %v992_v46  ;;  %v993_v49 = vunpack.i.l.bf16 %v992_v46  ;;  %v987_v50 = vpop.permute.xlu0 %986  ;;  %v426_v17 = vsel %vm423_vm0, %v409_v62, 0.0  ;;  %931 = vmatprep.subr.bf16.mxu0 %v1081_v39  ;;  %944 = vmatprep.subr.bf16.mxu1 %v1081_v39 }
  0x8f   : > { %v1161_v51 = vmax.f32 %v352_v45, %v353_v44  ;;  %v989_v52 = vunpack.i.h.bf16 %v987_v50  ;;  %v988_v53 = vunpack.i.l.bf16 %v987_v50  ;;  %v424_v10 = vsel %vm423_vm0, %v407_v57, 0.0 }
  0x90   : > { %v361_v54 = vmax.f32 %v281_v13, %v994_v48  ;;  %v360_v55 = vmax.f32 %v280_v12, %v993_v49  ;;  %v1010_v56 = vpack.i.bf16 %v1159_v47, %v1155_v40  ;;  %v410_v7 = vrot.slane %v1159_v47, 1 }
  0x91   : > { %v359_v58 = vmax.f32 %v279_v15, %v989_v52  ;;  %v358_v59 = vmax.f32 %v278_v14, %v988_v53  ;;  %v1005_v60 = vpack.i.bf16 %v1161_v51, %v1157_v41  ;;  %v1002_v61 = vpop.permute.xlu1 %1001  ;;  %v408_v3 = vrot.slane %v1161_v51, 1  ;;  %932 = vmatpush3.bf16.msra.mxu0 %v1081_v39  ;;  %947 = vmatpush3.bf16.msra.mxu1 %v1081_v39 }
  0x92   : > { %v1169_v63 = vmax.f32 %v360_v55, %v361_v54  ;;  %v997_v0 = vpop.permute.xlu0 %996  ;;  %1011 = vrot.lane.b32.xlu1 %v1010_v56, %s1092_s26  ;;  %v1004_v1 = vunpack.i.h.bf16 %v1002_v61  ;;  %v1003_v2 = vunpack.i.l.bf16 %v1002_v61  ;;  %v383_v35 = vrot.slane %v1161_v51, 7  ;;  %v1082_v61 = vld [vmem:[%s1334_s1 + $0x10] ss:$0 sps:$4 sm:$0x33]  }
  0x93   : > { %v1173_v4 = vmax.f32 %v358_v59, %v359_v58  ;;  %v999_v5 = vunpack.i.h.bf16 %v997_v0  ;;  %v998_v6 = vunpack.i.l.bf16 %v997_v0  ;;  %1006 = vrot.lane.b32.xlu0 %v1005_v60, %s1092_s26  ;;  %v425_v11 = vsel %vm423_vm0, %v408_v3, 0.0  ;;  %949 = vmatprep.subr.msk.bf16.mxu0 %vm618_vm4, %v1082_v61 }
  0x94   : > { %v365_v8 = vmax.f32 %v285_v19, %v1004_v1  ;;  %v364_v9 = vmax.f32 %v1146_v18, %v1003_v2  ;;  %v1020_v15 = vpack.i.bf16 %v425_v11, %v424_v10  ;;  %v427_v19 = vsel %vm423_vm0, %v410_v7, 0.0  ;;  %950 = vmatprep.subr.msk.bf16.mxu1 %vm618_vm4, %v1082_v61 }
  0x95   : > { %v363_v12 = vmax.f32 %v1150_v21, %v999_v5  ;;  %v362_v13 = vmax.f32 %v1148_v20, %v998_v6  ;;  %v1015_v14 = vpack.i.bf16 %v1169_v63, %v1173_v4  ;;  %v411_v16 = vrot.slane %v1173_v4, 1 }
  0x96   : > { %v412_v18 = vrot.slane %v1169_v63, 1  ;;  %v1190_v23 = vmax.f32 %v364_v9, %v365_v8  ;;  %v1025_v21 = vpack.i.bf16 %v427_v19, %v426_v17  ;;  %v385_v38 = vrot.slane %v1159_v47, 7 }
  0x97   : > { %v1188_v22 = vmax.f32 %v362_v13, %v363_v12  ;;  %1016 = vrot.lane.b32.xlu1 %v1015_v14, %s1092_s26  ;;  %1021 = vrot.lane.b32.xlu0 %v1020_v15, %s1093_s27  ;;  %v428_v20 = vsel %vm423_vm0, %v411_v16, 0.0  ;;  %v384_v42 = vrot.slane %v1155_v40, 7  ;;  %v387_v41 = vrot.slane %v1169_v63, 7 }
  0x98   : > { %v429_v25 = vsel %vm423_vm0, %v412_v18, 0.0  ;;  %v414_v29 = vrot.slane %v1190_v23, 1  ;;  %v400_v45 = vsel %vm398_vm1, 0.0, %v383_v35  ;;  %v399_v46 = vsel %vm398_vm1, 0.0, %v382_v34 }
  0x99   : > { %v413_v24 = vrot.slane %v1188_v22, 1  ;;  %v1030_v27 = vpack.i.bf16 %v1190_v23, %v1188_v22  ;;  %v402_v40 = vsel %vm398_vm1, 0.0, %v385_v38  ;;  %v386_v53 = vrot.slane %v1173_v4, 7 }
  0x9a   : > { %v431_v30 = vsel %vm423_vm0, %v414_v29, 0.0  ;;  %v401_v56 = vsel %vm398_vm1, 0.0, %v384_v42  ;;  %v388_v62 = vrot.slane %v1188_v22, 7  ;;  %v389_v1 = vrot.slane %v1190_v23, 7 }
  0x9b   : > { %472 = vrot.lane.b32.xlu1 %v428_v20, %s1093_s27  ;;  %1026 = vrot.lane.b32.xlu0 %v1025_v21, %s1093_s27  ;;  %v430_v26 = vsel %vm423_vm0, %v413_v24, 0.0  ;;  %v620_v5 = vsel %vm618_vm4, %v1082_v61, 0  ;;  %v403_v6 = vsel %vm398_vm1, 0.0, %v386_v53  ;;  %v404_v9 = vsel %vm398_vm1, 0.0, %v387_v41 }
  0x9c   : > { %v1035_v28 = vpack.i.bf16 %v430_v26, %v429_v25  ;;  %934 = vmatpush3.bf16.msra.mxu0 %v620_v5  ;;  %948 = vmatpush3.bf16.msra.mxu1 %v620_v5  ;;  %v405_v22 = vsel %vm398_vm1, 0.0, %v388_v62  ;;  %v406_v23 = vsel %vm398_vm1, 0.0, %v389_v1 }
  0x9f   : > { %1036 = vrot.lane.b32.xlu1 %v1035_v28, %s1093_s27  ;;  %1031 = vrot.lane.b32.xlu0 %v1030_v27, %s1092_s26 }
  0xa3   : > { %478 = vrot.lane.b32.xlu0 %v431_v30, %s1093_s27 }
 0x104   : > { %v1012_v31 = vpop.permute.xlu1 %1011 }
 0x105   : > { %v1007_v33 = vpop.permute.xlu0 %1006  ;;  %v1014_v47 = vunpack.i.h.bf16 %v1012_v31  ;;  %v1013_v50 = vunpack.i.l.bf16 %v1012_v31 }
 0x106   : > { %v1009_v36 = vunpack.i.h.bf16 %v1007_v33  ;;  %v1008_v37 = vunpack.i.l.bf16 %v1007_v33  ;;  %v1096_v33 = vmov 0.0  }
 0x107   : > { %v492_v2 = vsel %vm488_vm2, %v402_v40, %v1014_v47  ;;  %v491_v3 = vsel %vm488_vm2, %v401_v56, %v1013_v50 }
 0x108   : > { %v490_v51 = vsel %vm488_vm2, %v400_v45, %v1009_v36  ;;  %v489_v52 = vsel %vm488_vm2, %v399_v46, %v1008_v37 }
 0x109   : > { %v1017_v43 = vpop.permute.xlu1 %1016  ;;  %v1022_v44 = vpop.permute.xlu0 %1021 }
 0x10a   : > { %v1024_v48 = vunpack.i.h.bf16 %v1022_v44  ;;  %v1023_v49 = vunpack.i.l.bf16 %v1022_v44  ;;  %v1018_v57 = vunpack.i.l.bf16 %v1017_v43  ;;  %v1019_v4 = vunpack.i.h.bf16 %v1017_v43 }
 0x10c   : > { %v1220_v54 = vsel %vm497_vm3, %v489_v52, %v1023_v49  ;;  %v1223_v55 = vsel %vm497_vm3, %v490_v51, %v1024_v48  ;;  %v493_v10 = vsel %vm488_vm2, %v403_v6, %v1018_v57  ;;  %v494_v18 = vsel %vm488_vm2, %v404_v9, %v1019_v4 }
 0x10d   : > { %v473_v58 = vpop.permute.xlu1 %472  ;;  %v1027_v59 = vpop.permute.xlu0 %1026  ;;  %v1040_v60 = vpack.i.bf16 %v1223_v55, %v1220_v54 }
 0x10e   : > { %v1029_v63 = vunpack.i.h.bf16 %v1027_v59  ;;  %v1028_v0 = vunpack.i.l.bf16 %v1027_v59  ;;  %v502_v20 = vsel %vm497_vm3, %v493_v10, %v473_v58 }
 0x10f   : > { %1041 = vrot.lane.b32.xlu1 %v1040_v60, %s1094_s10 }
 0x110   : > { %v500_v7 = vsel %vm497_vm3, %v491_v3, %v1028_v0  ;;  %v1241_v8 = vsel %vm497_vm3, %v492_v2, %v1029_v63 }
 0x111   : > { %v1037_v11 = vpop.permute.xlu1 %1036  ;;  %v1032_v12 = vpop.permute.xlu0 %1031  ;;  %v1045_v13 = vpack.i.bf16 %v1241_v8, %v500_v7  ;;  %v1050_v14 = vpack.i.bf16 %v500_v7, %v1223_v55  ;;  %v1055_v27 = vpack.i.bf16 %v502_v20, %v1241_v8 }
 0x112   : > { %v1039_v15 = vunpack.i.h.bf16 %v1037_v11  ;;  %v1038_v16 = vunpack.i.l.bf16 %v1037_v11  ;;  %v1034_v17 = vunpack.i.h.bf16 %v1032_v12  ;;  %v1033_v19 = vunpack.i.l.bf16 %v1032_v12 }
 0x113   : > { %1046 = vrot.lane.b32.xlu0 %v1045_v13, %s1094_s10  ;;  %1051 = vrot.lane.b32.xlu1 %v1050_v14, %s1095_s11 }
 0x114   : > { %v495_v21 = vsel %vm488_vm2, %v405_v22, %v1033_v19  ;;  %v496_v24 = vsel %vm488_vm2, %v406_v23, %v1034_v17  ;;  %v503_v25 = vsel %vm497_vm3, %v494_v18, %v1038_v16 }
 0x115   : > { %v479_v26 = vpop.permute.xlu0 %478  ;;  %v1060_v28 = vpack.i.bf16 %v503_v25, %v502_v20  ;;  %v504_v30 = vsel %vm497_vm3, %v495_v21, %v1039_v15 }
 0x116   : > { %v505_v29 = vsel %vm497_vm3, %v496_v24, %v479_v26  ;;  %v1070_v32 = vpack.i.bf16 %v504_v30, %v503_v25 }
 0x117   : > { %1056 = vrot.lane.b32.xlu0 %v1055_v27, %s1095_s11  ;;  %1061 = vrot.lane.b32.xlu1 %v1060_v28, %s1094_s10  ;;  %v1065_v31 = vpack.i.bf16 %v505_v29, %v504_v30  ;;  %v1075_v34 = vpack.i.bf16 %v1096_v33, %v505_v29 }
 0x11b   : > { %1066 = vrot.lane.b32.xlu0 %v1065_v31, %s1094_s10  ;;  %1071 = vrot.lane.b32.xlu1 %v1070_v32, %s1095_s11 }
 0x11f   : > { %1076 = vrot.lane.b32.xlu0 %v1075_v34, %s1095_s11 }
 0x181   : > { %v1042_v35 = vpop.permute.xlu1 %1041 }
 0x182   : > { %v1044_v36 = vunpack.i.h.bf16 %v1042_v35  ;;  %v1043_v37 = vunpack.i.l.bf16 %v1042_v35 }
 0x184   : > { %v564_v43 = vsel %vm563_vm5, 0.0, %v1043_v37  ;;  %v565_v46 = vsel %vm563_vm5, %v1220_v54, %v1044_v36 }
 0x185   : > { %v1047_v38 = vpop.permute.xlu0 %1046  ;;  %v1052_v39 = vpop.permute.xlu1 %1051 }
 0x186   : > { %v1054_v42 = vunpack.i.h.bf16 %v1052_v39  ;;  %v1053_v41 = vunpack.i.l.bf16 %v1052_v39  ;;  %v1049_v44 = vunpack.i.h.bf16 %v1047_v38  ;;  %v1048_v45 = vunpack.i.l.bf16 %v1047_v38 }
 0x188   : > { %v573_v48 = vsel %vm572_vm6, %v564_v43, %v1053_v41  ;;  %v574_v49 = vsel %vm572_vm6, %v565_v46, %v1054_v42  ;;  %v567_v53 = vsel %vm563_vm5, %v500_v7, %v1049_v44  ;;  %v566_v56 = vsel %vm563_vm5, %v1223_v55, %v1048_v45 }
 0x189   : > { %v1057_v47 = vpop.permute.xlu0 %1056  ;;  %v1062_v50 = vpop.permute.xlu1 %1061  ;;  %v581_v51 = vpack.c.bf16 %v574_v49, %v573_v48 }
 0x18a   : > { %v1059_v52 = vunpack.i.h.bf16 %v1057_v47  ;;  %v1058_v40 = vunpack.i.l.bf16 %v1057_v47  ;;  %v1064_v57 = vunpack.i.h.bf16 %v1062_v50  ;;  %v1063_v58 = vunpack.i.l.bf16 %v1062_v50 }
 0x18b   : > { %935 = vmatprep.mubr.msk.bf16.mxu0 %vm605_vm7, %v581_v51 }
 0x18c   : > { %v575_v54 = vsel %vm572_vm6, %v566_v56, %v1058_v40  ;;  %v576_v59 = vsel %vm572_vm6, %v567_v53, %v1059_v52  ;;  %v568_v55 = vsel %vm563_vm5, %v1241_v8, %v1063_v58  ;;  %v569_v3 = vsel %vm563_vm5, %v502_v20, %v1064_v57 }
 0x18d   : > { %v582_v60 = vpack.c.bf16 %v576_v59, %v575_v54  ;;  %v1067_v61 = vpop.permute.xlu0 %1066  ;;  %v1072_v62 = vpop.permute.xlu1 %1071 }
 0x18e   : > { %v1074_v63 = vunpack.i.h.bf16 %v1072_v62  ;;  %v1073_v0 = vunpack.i.l.bf16 %v1072_v62  ;;  %v1069_v1 = vunpack.i.h.bf16 %v1067_v61  ;;  %v1068_v2 = vunpack.i.l.bf16 %v1067_v61 }
 0x18f   : > { %936 = vmatmul.mubr.msk.bf16.vlgmr.msra.gmra.mrb[0].mxu0 %vm605_vm7, %v582_v60 }
 0x190   : > { %v577_v4 = vsel %vm572_vm6, %v568_v55, %v1073_v0  ;;  %v578_v5 = vsel %vm572_vm6, %v569_v3, %v1074_v63  ;;  %v571_v11 = vsel %vm563_vm5, %v504_v30, %v1069_v1  ;;  %v570_v12 = vsel %vm563_vm5, %v503_v25, %v1068_v2 }
 0x191   : > { %v1077_v6 = vpop.permute.xlu0 %1076  ;;  %v583_v7 = vpack.c.bf16 %v578_v5, %v577_v4 }
 0x192   : > { %v1079_v9 = vunpack.i.h.bf16 %v1077_v6  ;;  %v1078_v10 = vunpack.i.l.bf16 %v1077_v6 }
 0x193   : > { %939 = vmatprep.mubr.msk.bf16.mxu1 %vm605_vm7, %v583_v7 }
 0x194   : > { %v579_v13 = vsel %vm572_vm6, %v570_v12, %v1078_v10  ;;  %v580_v8 = vsel %vm572_vm6, %v571_v11, %v1079_v9 }
 0x195   : > { %v584_v14 = vpack.c.bf16 %v580_v8, %v579_v13 }
 0x197   : > { %940 = vmatmul.mubr.msk.bf16.vlgmr.msra.gmra.mrb[0].mxu1 %vm605_vm7, %v584_v14 }
 0x262   : > { %v937_v15 = vpop.f32.mrb[0].mxu0 }
 0x263   : > { %v916_v16 = vpack.c.bf16 %v937_v15, %v937_v15  ;;  %v656_v17 = vpop.f32.mrb[1].mxu0  ;;  %v712_v23 = vmul.f32 %v937_v15, %v937_v15  ;;  %v690_v30 = vsel %vm497_vm3, %v937_v15, 0.0 }
 0x264   : > { %v710_v19 = vmul.f32 %v656_v17, %v656_v17  ;;  %v914_v18 = vpack.c.bf16 %v656_v17, %v656_v17  ;;  %v938_v22 = vpop.f32.mrb[2].mxu0  ;;  %v687_v24 = vsel %vm497_vm3, %v656_v17, 0.0 }
 0x265   : > { %775 = vst.msk [vmem:[%s1288_s15 + $0x8] sm:$0xf] %vm772_vm8, %v916_v16  ;;  %v917_v20 = vpack.c.bf16 %v938_v22, %v938_v22  ;;  %v659_v21 = vpop.f32.mrb[3].mxu0  ;;  %v713_v28 = vmul.f32 %v938_v22, %v938_v22  ;;  %v721_v35 = vsel %vm497_vm3, %v712_v23, 0.0  ;;  %v692_v37 = vsel %vm497_vm3, %v938_v22, 0.0 }
 0x266   : > { %773 = vst.msk [vmem:[%s1288_s15] sm:$0xf] %vm772_vm8, %v914_v18  ;;  %v688_v25 = vsel %vm497_vm3, %v659_v21, 0.0  ;;  %v711_v26 = vmul.f32 %v659_v21, %v659_v21  ;;  %v915_v27 = vpack.c.bf16 %v659_v21, %v659_v21  ;;  %v718_v31 = vsel %vm497_vm3, %v710_v19, 0.0 }
 0x267   : > { %776 = vst.msk [vmem:[%s1288_s15 + $0xc] sm:$0xf] %vm772_vm8, %v917_v20  ;;  %v689_v29 = vadd.f32 %v688_v25, %v687_v24  ;;  %v723_v38 = vsel %vm497_vm3, %v713_v28, 0.0 }
 0x268   : > { %v719_v32 = vsel %vm497_vm3, %v711_v26, 0.0  ;;  %774 = vst.msk [vmem:[%s1288_s15 + $0x4] sm:$0xf] %vm772_vm8, %v915_v27 }
 0x269   : > { %v691_v33 = vadd.f32 %v690_v30, %v689_v29  ;;  %v720_v34 = vadd.f32 %v719_v32, %v718_v31 }
 0x26a   : > { %v941_v36 = vpop.f32.mrb[0].mxu1 }
 0x26b   : > { %v722_v39 = vadd.f32 %v721_v35, %v720_v34  ;;  %v920_v42 = vpack.c.bf16 %v941_v36, %v941_v36  ;;  %v672_v41 = vpop.f32.mrb[1].mxu1  ;;  %v693_v43 = vadd.f32 %v692_v37, %v691_v33  ;;  %v716_v53 = vmul.f32 %v941_v36, %v941_v36 }
 0x26c   : > { %v694_v44 = vsel %vm497_vm3, %v672_v41, 0.0  ;;  %v714_v45 = vmul.f32 %v672_v41, %v672_v41  ;;  %v918_v46 = vpack.c.bf16 %v672_v41, %v672_v41  ;;  %v942_v48 = vpop.f32.mrb[2].mxu1  ;;  %v698_v59 = vsel %vm497_vm3, %v941_v36, 0.0 }
 0x26d   : > { %779 = vst.msk [vmem:[%s1288_s15 + $0x18] sm:$0xf] %vm772_vm8, %v920_v42  ;;  %v724_v49 = vadd.f32 %v723_v38, %v722_v39  ;;  %v675_v47 = vpop.f32.mrb[3].mxu1  ;;  %v695_v50 = vadd.f32 %v694_v44, %v693_v43  ;;  %v921_v52 = vpack.c.bf16 %v942_v48, %v942_v48  ;;  %v717_v60 = vmul.f32 %v942_v48, %v942_v48 }
 0x26e   : > { %v725_v51 = vsel %vm497_vm3, %v714_v45, 0.0  ;;  %777 = vst.msk [vmem:[%s1288_s15 + $0x10] sm:$0xf] %vm772_vm8, %v918_v46  ;;  %v696_v40 = vsel %vm497_vm3, %v675_v47, 0.0  ;;  %v715_v57 = vmul.f32 %v675_v47, %v675_v47  ;;  %v919_v58 = vpack.c.bf16 %v675_v47, %v675_v47 }
 0x26f   : > { %v726_v56 = vadd.f32 %v725_v51, %v724_v49  ;;  %780 = vst.msk [vmem:[%s1288_s15 + $0x1c] sm:$0xf] %vm772_vm8, %v921_v52  ;;  %v697_v54 = vadd.f32 %v696_v40, %v695_v50  ;;  %v729_v0 = vsel %vm497_vm3, %v716_v53, 0.0  ;;  %v700_v1 = vsel %vm497_vm3, %v942_v48, 0.0 }
 0x270   : > { %v727_v61 = vsel %vm497_vm3, %v715_v57, 0.0  ;;  %778 = vst.msk [vmem:[%s1288_s15 + $0x14] sm:$0xf] %vm772_vm8, %v919_v58  ;;  %v731_v3 = vsel %vm497_vm3, %v717_v60, 0.0 }
 0x271   : > { %v699_v62 = vadd.f32 %v698_v59, %v697_v54  ;;  %v728_v63 = vadd.f32 %v727_v61, %v726_v56 }
 0x273   : > { %v701_v2 = vadd.f32 %v700_v1, %v699_v62  ;;  %v730_v55 = vadd.f32 %v729_v0, %v728_v63 }
 0x275   : > { %v702_v4 = vrot.slane %v701_v2, 4  ;;  %v732_v5 = vadd.f32 %v731_v3, %v730_v55 }
 0x277   : > { %v703_v6 = vadd.f32 %v702_v4, %v701_v2  ;;  %v733_v7 = vrot.slane %v732_v5, 4 }
 0x279   : > { %v704_v9 = vrot.slane %v703_v6, 2  ;;  %v734_v10 = vadd.f32 %v733_v7, %v732_v5 }
 0x27b   : > { %v705_v11 = vadd.f32 %v704_v9, %v703_v6  ;;  %v735_v12 = vrot.slane %v734_v10, 2 }
 0x27d   : > { %v706_v13 = vrot.slane %v705_v11, 1  ;;  %v736_v8 = vadd.f32 %v735_v12, %v734_v10 }
 0x27f   : > { %v707_v14 = vadd.f32 %v706_v13, %v705_v11  ;;  %v737_v15 = vrot.slane %v736_v8, 1 }
 0x281   : > { %709 = vst.msk [vmem:[%s265_s18] sm:$0x1] %vm708_vm9, %v707_v14  ;;  %v738_v16 = vadd.f32 %v737_v15, %v736_v8 }
 0x283   : > { %739 = vst.msk [vmem:[%s268_s3] sm:$0x1] %vm708_vm9, %v738_v16 }
 0x284 PF: > { %s17_s21 = sadd.s32 1, %s1089_s21  }
 0x285   : > { %p14_p4 = scmp.ge.s32.totalorder %s17_s21, 4  }
 0x287   :  { %16 = sbr.rel (!%p14_p4) target bundleno = 1 (0x1), region = 90 }

// kernel: down_w_options.4
= control target key start
LH: loop header
LB: loop body
LE: loop exit
PB: predicated region body
PF: predicated region fallthrough
CT: control target
= control target key end

     0   :  { %s1091_s21 = smov 0   ;;  %s1292_s0 = inlined_call_operand.vmem [shape: bf16[2,8,8,8], index: 0, kind: input, shape index: {}]   ;;  %s1293_s1 = inlined_call_operand.vmem [shape: bf16[72,8], index: 1, kind: input, shape index: {}]   ;;  %s1294_s2 = inlined_call_operand.vmem [shape: f32[1,8], index: 2, kind: input, shape index: {}]   ;;  %s1295_s3 = inlined_call_operand.vmem [shape: f32[1,8], index: 3, kind: input, shape index: {}]   ;;  %s1296_s4 = inlined_call_operand.vmem [shape: bf16[2,64,8], index: 4, kind: output, shape index: {0}]   ;;  %s1297_s5 = inlined_call_operand.vmem [shape: f32[2,1,8], index: 5, kind: output, shape index: {1}]   ;;  %s1298_s6 = inlined_call_operand.vmem [shape: f32[2,1,8], index: 6, kind: output, shape index: {2}]  }
   0x1 LB: > { %s852_s22 = sadd.s32 4294967295, %s1049_s21   ;;  %p856_p0 = scmp.ge.s32.totalorder %s1049_s21, 1  ;;  %s1049_s21 = sphi %s1091_s21, %s17_s21  }
   0x2   : > { %p217_p1 = scmp.lt.s32.totalorder %s1049_s21, 3 }
   0x4   : > { %p218_p2 = pnand %p856_p0, %p217_p1 }
   0x5   : > { %p253_p3 = scmp.lt.s32.totalorder (!%p218_p2), %s852_s22, 1  ;;  %v861_v0 = vld [vmem:[%s1294_s2] ss:$0 sm:$0xff] (!%p218_p2)  ;;  %vm373_vm0 = vcmask (!%p218_p2), 1046528   ;;  %s1051_s7 = smov (!%p218_p2), 8   ;;  %v1039_v61 = vld [vmem:[%s1293_s1 + $0x8] sm:$0xff] (!%p218_p2)  }
   0x6   : > { %221 = sbr.rel (%p218_p2) target bundleno = 524 (0x20c), region = 36  ;;  %v862_v9 = vld [vmem:[%s1295_s3] ss:$0 sm:$0xff] (!%p218_p2)  ;;  %s1052_s8 = smov (!%p218_p2), 16   ;;  %v1040_v63 = vld [vmem:[%s1293_s1 + $0x10] sm:$0xff] (!%p218_p2)   ;;  %vm348_vm1 = vcmask (!%p218_p2), 1040384  }
   0x7   : > { %v1038_v60 = vld [vmem:[%s1293_s1] sm:$0xff] (!%p218_p2)   ;;  %vm438_vm2 = vcmask (!%p218_p2), 64512   ;;  %vm447_vm3 = vcmask (!%p218_p2), 130048   ;;  %vm584_vm4 = vcmask (!%p218_p2), 1043456   ;;  %s1053_s19 = smov (!%p218_p2), 24   ;;  %s1054_s20 = smov (!%p218_p2), 48  }
   0x8   : > { %920 = vmatprep.subr.bf16.mxu0 (!%p218_p2), %v1038_v60  ;;  %938 = vmatprep.subr.bf16.mxu1 (!%p218_p2), %v1038_v60  ;;  %vm513_vm5 = vcmask (!%p218_p2), 195584   ;;  %vm522_vm6 = vcmask (!%p218_p2), 392192   ;;  %vm571_vm7 = vcmask (!%p218_p2), 588800   ;;  %vm738_vm8 = vcmask (!%p218_p2), 60416  }
   0x9   : > { %921 = vmatpush3.bf16.msra.mxu0 (!%p218_p2), %v1038_v60  ;;  %943 = vmatpush3.bf16.msra.mxu1 (!%p218_p2), %v1038_v60  ;;  %vm674_vm9 = vcmask (!%p218_p2), 57344  }
   0xa   : > { %922 = vmatprep.subr.bf16.mxu0 (!%p218_p2), %v1039_v61  ;;  %939 = vmatprep.subr.bf16.mxu1 (!%p218_p2), %v1039_v61 }
   0xd   : > { %s1300_s22 = smov (!%p253_p3, %s852_s22), 1  ;;  %923 = vmatpush3.bf16.msra.mxu0 %v1039_v61  ;;  %944 = vmatpush3.bf16.msra.mxu1 %v1039_v61 }
   0xe   : > { %s882_s23 = sshll.u32 %s1300_s22, 5  ;;  %924 = vmatprep.subr.bf16.mxu0 %v1040_v63  ;;  %940 = vmatprep.subr.bf16.mxu1 %v1040_v63  ;;  %s265_s28 = scalar_lea.vmem %s1297_s5, %s1300_s22 }
   0xf   : > { %s257_s26 = scalar_lea.vmem %s1292_s0, %s882_s23 }
  0x10   : > { %v909_v1 = vld [vmem:[%s257_s26 + $0x10] sm:$0xff]   ;;  %v893_v2 = vld [vmem:[%s257_s26] sm:$0xff]   ;;  %v908_v3 = vld [vmem:[%s257_s26 + $0x8] sm:$0xff]  }
  0x11   : > { %v902_v4 = vunpack.c.l.bf16 %v909_v1  ;;  %v903_v5 = vunpack.c.h.bf16 %v909_v1  ;;  %v894_v6 = vunpack.c.l.bf16 %v893_v2  ;;  %v895_v7 = vunpack.c.h.bf16 %v893_v2  ;;  %v910_v8 = vld [vmem:[%s257_s26 + $0x18] sm:$0xff]   ;;  %925 = vmatpush3.bf16.msra.mxu0 %v1040_v63  ;;  %945 = vmatpush3.bf16.msra.mxu1 %v1040_v63  ;;  %s1247_s26 = scalar_lea.vmem %s1296_s4, %s882_s23 }
  0x12   : > { %v898_v10 = vunpack.c.l.bf16 %v908_v3  ;;  %v899_v11 = vunpack.c.h.bf16 %v908_v3  ;;  %v906_v12 = vunpack.c.l.bf16 %v910_v8  ;;  %v907_v13 = vunpack.c.h.bf16 %v910_v8 }
  0x13   : > { %v298_v14 = vmul.f32 %v902_v4, %v861_v0  ;;  %v299_v15 = vmul.f32 %v903_v5, %v861_v0  ;;  %v294_v16 = vmul.f32 %v894_v6, %v861_v0  ;;  %v295_v17 = vmul.f32 %v895_v7, %v861_v0  ;;  %v1041_v4 = vld [vmem:[%s1293_s1 + $0x18] sm:$0xff]  }
  0x14   : > { %v296_v18 = vmul.f32 %v898_v10, %v861_v0  ;;  %v297_v19 = vmul.f32 %v899_v11, %v861_v0  ;;  %v300_v20 = vmul.f32 %v906_v12, %v861_v0  ;;  %v301_v27 = vmul.f32 %v907_v13, %v861_v0  ;;  %926 = vmatprep.subr.bf16.mxu0 %v1041_v4 }
  0x15   : > { %v312_v21 = vadd.f32 %v862_v9, %v298_v14  ;;  %v313_v22 = vadd.f32 %v862_v9, %v299_v15  ;;  %v308_v23 = vadd.f32 %v862_v9, %v294_v16  ;;  %v309_v24 = vadd.f32 %v862_v9, %v295_v17  ;;  %941 = vmatprep.subr.bf16.mxu1 %v1041_v4  ;;  %v1042_v14 = vld [vmem:[%s1293_s1 + $0x20] ss:$0 sps:$4 sm:$0xff]  }
  0x16   : > { %v310_v25 = vadd.f32 %v862_v9, %v296_v18  ;;  %v311_v26 = vadd.f32 %v862_v9, %v297_v19  ;;  %v314_v28 = vadd.f32 %v862_v9, %v300_v20  ;;  %v315_v42 = vadd.f32 %v862_v9, %v301_v27  ;;  %927 = vmatpush3.bf16.msra.mxu0 %v1041_v4 }
  0x17   : > { %v1113_v29 = vmax.f32 %v312_v21, 0.0  ;;  %v1115_v30 = vmax.f32 %v313_v22, 0.0  ;;  %v1117_v31 = vmax.f32 %v308_v23, 0.0  ;;  %v1119_v32 = vmax.f32 %v309_v24, 0.0  ;;  %946 = vmatpush3.bf16.msra.mxu1 %v1041_v4  ;;  %948 = vmatprep.subr.msk.bf16.mxu0 %vm584_vm4, %v1042_v14 }
  0x18   : > { %v1121_v33 = vmax.f32 %v310_v25, 0.0  ;;  %v1123_v34 = vmax.f32 %v311_v26, 0.0  ;;  %v1125_v35 = vmax.f32 %v314_v28, 0.0  ;;  %v1144_v53 = vmax.f32 %v315_v42, 0.0  ;;  %949 = vmatprep.subr.msk.bf16.mxu1 %vm584_vm4, %v1042_v14 }
  0x19   : > { %v973_v36 = vpack.i.bf16 %v1115_v30, %v1113_v29  ;;  %v963_v37 = vpack.i.bf16 %v1119_v32, %v1117_v31  ;;  %v357_v38 = vrot.slane %v1117_v31, 1  ;;  %v358_v39 = vrot.slane %v1119_v32, 1 }
  0x1a   : > { %v359_v40 = vrot.slane %v1121_v33, 1  ;;  %v360_v41 = vrot.slane %v1123_v34, 1  ;;  %v968_v43 = vpack.i.bf16 %v1123_v34, %v1121_v33  ;;  %v361_v46 = vrot.slane %v1113_v29, 1 }
  0x1b   : > { %974 = vrot.lane.b32.xlu1 %v973_v36, %s1051_s7  ;;  %964 = vrot.lane.b32.xlu0 %v963_v37, %s1051_s7  ;;  %v374_v44 = vsel %vm373_vm0, %v357_v38, 0.0  ;;  %v375_v45 = vsel %vm373_vm0, %v358_v39, 0.0  ;;  %v362_v50 = vrot.slane %v1115_v30, 1  ;;  %v363_v51 = vrot.slane %v1125_v35, 1 }
  0x1c   : > { %v978_v47 = vpack.i.bf16 %v375_v45, %v374_v44  ;;  %v376_v48 = vsel %vm373_vm0, %v359_v40, 0.0  ;;  %v377_v49 = vsel %vm373_vm0, %v360_v41, 0.0  ;;  %v378_v54 = vsel %vm373_vm0, %v361_v46, 0.0 }
  0x1d   : > { %v983_v52 = vpack.i.bf16 %v377_v49, %v376_v48  ;;  %v379_v55 = vsel %vm373_vm0, %v362_v50, 0.0  ;;  %v380_v56 = vsel %vm373_vm0, %v363_v51, 0.0  ;;  %v988_v57 = vpack.i.bf16 %v1144_v53, %v1125_v35 }
  0x1e   : > { %v993_v58 = vpack.i.bf16 %v380_v56, %v379_v55  ;;  %v364_v59 = vrot.slane %v1144_v53, 1  ;;  %v333_v0 = vrot.slane %v1119_v32, 7  ;;  %v332_v1 = vrot.slane %v1117_v31, 7 }
  0x1f   : > { %969 = vrot.lane.b32.xlu0 %v968_v43, %s1051_s7  ;;  %979 = vrot.lane.b32.xlu1 %v978_v47, %s1052_s8  ;;  %v334_v9 = vrot.slane %v1121_v33, 7  ;;  %v335_v10 = vrot.slane %v1123_v34, 7  ;;  %v337_v11 = vrot.slane %v1115_v30, 7  ;;  %v336_v18 = vrot.slane %v1113_v29, 7 }
  0x20   : > { %v381_v62 = vsel %vm373_vm0, %v364_v59, 0.0  ;;  %v350_v6 = vsel %vm348_vm1, 0.0, %v333_v0  ;;  %v349_v8 = vsel %vm348_vm1, 0.0, %v332_v1  ;;  %v338_v29 = vrot.slane %v1125_v35, 7 }
  0x21   : > { %v351_v22 = vsel %vm348_vm1, 0.0, %v334_v9  ;;  %v352_v23 = vsel %vm348_vm1, 0.0, %v335_v10  ;;  %v339_v30 = vrot.slane %v1144_v53, 7  ;;  %v586_v31 = vsel %vm584_vm4, %v1042_v14, 0 }
  0x22   : > { %929 = vmatpush3.bf16.msra.mxu0 %v586_v31  ;;  %947 = vmatpush3.bf16.msra.mxu1 %v586_v31  ;;  %v354_v35 = vsel %vm348_vm1, 0.0, %v337_v11  ;;  %v353_v39 = vsel %vm348_vm1, 0.0, %v336_v18  ;;  %v355_v42 = vsel %vm348_vm1, 0.0, %v338_v29  ;;  %v1055_v1 = vmov 0.0  }
  0x23   : > { %984 = vrot.lane.b32.xlu0 %v983_v52, %s1052_s8  ;;  %422 = vrot.lane.b32.xlu1 %v378_v54, %s1052_s8  ;;  %v356_v47 = vsel %vm348_vm1, 0.0, %v339_v30 }
  0x27   : > { %989 = vrot.lane.b32.xlu0 %v988_v57, %s1051_s7  ;;  %994 = vrot.lane.b32.xlu1 %v993_v58, %s1052_s8  ;;  %s268_s7 = scalar_lea.vmem %s1298_s6, %s1300_s22 }
  0x2b   : > { %428 = vrot.lane.b32.xlu0 %v381_v62, %s1052_s8 }
  0x8d   : > { %v1164_v2 = vpop.permute.xlu1 %974  ;;  %v965_v3 = vpop.permute.xlu0 %964 }
  0x8e   : > { %v967_v5 = vunpack.i.h.bf16 %v965_v3  ;;  %v966_v7 = vunpack.i.l.bf16 %v965_v3  ;;  %v977_v34 = vunpack.i.h.bf16 %v1164_v2  ;;  %v976_v36 = vunpack.i.l.bf16 %v1164_v2 }
  0x90   : > { %v440_v15 = vsel %vm438_vm2, %v350_v6, %v967_v5  ;;  %v439_v19 = vsel %vm438_vm2, %v349_v8, %v966_v7  ;;  %v444_v52 = vsel %vm438_vm2, %v354_v35, %v977_v34  ;;  %v443_v53 = vsel %vm438_vm2, %v353_v39, %v976_v36 }
  0x91   : > { %v970_v12 = vpop.permute.xlu0 %969  ;;  %v980_v13 = vpop.permute.xlu1 %979 }
  0x92   : > { %v982_v16 = vunpack.i.h.bf16 %v980_v13  ;;  %v981_v17 = vunpack.i.l.bf16 %v980_v13  ;;  %v972_v20 = vunpack.i.h.bf16 %v970_v12  ;;  %v971_v21 = vunpack.i.l.bf16 %v970_v12 }
  0x94   : > { %v1183_v24 = vsel %vm447_vm3, %v439_v19, %v981_v17  ;;  %v1186_v25 = vsel %vm447_vm3, %v440_v15, %v982_v16  ;;  %v442_v37 = vsel %vm438_vm2, %v352_v23, %v972_v20  ;;  %v441_v38 = vsel %vm438_vm2, %v351_v22, %v971_v21 }
  0x95   : > { %v985_v26 = vpop.permute.xlu0 %984  ;;  %v423_v27 = vpop.permute.xlu1 %422  ;;  %v998_v28 = vpack.i.bf16 %v1186_v25, %v1183_v24 }
  0x96   : > { %v987_v32 = vunpack.i.h.bf16 %v985_v26  ;;  %v986_v33 = vunpack.i.l.bf16 %v985_v26  ;;  %v452_v54 = vsel %vm447_vm3, %v443_v53, %v423_v27 }
  0x97   : > { %999 = vrot.lane.b32.xlu1 %v998_v28, %s1053_s19 }
  0x98   : > { %v450_v40 = vsel %vm447_vm3, %v441_v38, %v986_v33  ;;  %v1201_v41 = vsel %vm447_vm3, %v442_v37, %v987_v32 }
  0x99   : > { %v990_v43 = vpop.permute.xlu0 %989  ;;  %v995_v44 = vpop.permute.xlu1 %994  ;;  %v1003_v45 = vpack.i.bf16 %v1201_v41, %v450_v40  ;;  %v1008_v46 = vpack.i.bf16 %v450_v40, %v1186_v25  ;;  %v1013_v59 = vpack.i.bf16 %v452_v54, %v1201_v41 }
  0x9a   : > { %v992_v48 = vunpack.i.h.bf16 %v990_v43  ;;  %v991_v49 = vunpack.i.l.bf16 %v990_v43  ;;  %v997_v50 = vunpack.i.h.bf16 %v995_v44  ;;  %v996_v51 = vunpack.i.l.bf16 %v995_v44 }
  0x9b   : > { %1004 = vrot.lane.b32.xlu0 %v1003_v45, %s1053_s19  ;;  %1009 = vrot.lane.b32.xlu1 %v1008_v46, %s1054_s20 }
  0x9c   : > { %v445_v55 = vsel %vm438_vm2, %v355_v42, %v991_v49  ;;  %v446_v56 = vsel %vm438_vm2, %v356_v47, %v992_v48  ;;  %v453_v57 = vsel %vm447_vm3, %v444_v52, %v996_v51 }
  0x9d   : > { %v429_v58 = vpop.permute.xlu0 %428  ;;  %v1018_v60 = vpack.i.bf16 %v453_v57, %v452_v54  ;;  %v454_v62 = vsel %vm447_vm3, %v445_v55, %v997_v50 }
  0x9e   : > { %v455_v61 = vsel %vm447_vm3, %v446_v56, %v429_v58  ;;  %v1028_v0 = vpack.i.bf16 %v454_v62, %v453_v57 }
  0x9f   : > { %v1023_v63 = vpack.i.bf16 %v455_v61, %v454_v62  ;;  %1014 = vrot.lane.b32.xlu0 %v1013_v59, %s1054_s20  ;;  %1019 = vrot.lane.b32.xlu1 %v1018_v60, %s1053_s19  ;;  %v1033_v2 = vpack.i.bf16 %v1055_v1, %v455_v61 }
  0xa3   : > { %1024 = vrot.lane.b32.xlu0 %v1023_v63, %s1053_s19  ;;  %1029 = vrot.lane.b32.xlu1 %v1028_v0, %s1054_s20 }
  0xa7   : > { %1034 = vrot.lane.b32.xlu0 %v1033_v2, %s1054_s20 }
 0x109   : > { %v1000_v3 = vpop.permute.xlu1 %999 }
 0x10a   : > { %v1002_v4 = vunpack.i.h.bf16 %v1000_v3  ;;  %v1001_v5 = vunpack.i.l.bf16 %v1000_v3 }
 0x10c   : > { %v514_v10 = vsel %vm513_vm5, 0.0, %v1001_v5  ;;  %v515_v13 = vsel %vm513_vm5, %v1183_v24, %v1002_v4 }
 0x10d   : > { %v1005_v6 = vpop.permute.xlu0 %1004  ;;  %v1010_v7 = vpop.permute.xlu1 %1009 }
 0x10e   : > { %v1012_v8 = vunpack.i.h.bf16 %v1010_v7  ;;  %v1011_v9 = vunpack.i.l.bf16 %v1010_v7  ;;  %v1007_v11 = vunpack.i.h.bf16 %v1005_v6  ;;  %v1006_v12 = vunpack.i.l.bf16 %v1005_v6 }
 0x110   : > { %v523_v14 = vsel %vm522_vm6, %v514_v10, %v1011_v9  ;;  %v524_v15 = vsel %vm522_vm6, %v515_v13, %v1012_v8  ;;  %v517_v21 = vsel %vm513_vm5, %v450_v40, %v1007_v11  ;;  %v516_v22 = vsel %vm513_vm5, %v1186_v25, %v1006_v12 }
 0x111   : > { %v1015_v16 = vpop.permute.xlu0 %1014  ;;  %v1020_v17 = vpop.permute.xlu1 %1019  ;;  %v531_v18 = vpack.c.bf16 %v524_v15, %v523_v14 }
 0x112   : > { %v1017_v19 = vunpack.i.h.bf16 %v1015_v16  ;;  %v1016_v20 = vunpack.i.l.bf16 %v1015_v16  ;;  %v1022_v23 = vunpack.i.h.bf16 %v1020_v17  ;;  %v1021_v26 = vunpack.i.l.bf16 %v1020_v17 }
 0x113   : > { %930 = vmatprep.mubr.msk.bf16.mxu0 %vm571_vm7, %v531_v18 }
 0x114   : > { %v526_v24 = vsel %vm522_vm6, %v517_v21, %v1017_v19  ;;  %v525_v27 = vsel %vm522_vm6, %v516_v22, %v1016_v20  ;;  %v518_v25 = vsel %vm513_vm5, %v1201_v41, %v1021_v26  ;;  %v519_v36 = vsel %vm513_vm5, %v452_v54, %v1022_v23 }
 0x115   : > { %v532_v28 = vpack.c.bf16 %v526_v24, %v525_v27  ;;  %v1025_v29 = vpop.permute.xlu0 %1024  ;;  %v1030_v30 = vpop.permute.xlu1 %1029 }
 0x116   : > { %v1032_v31 = vunpack.i.h.bf16 %v1030_v30  ;;  %v1031_v32 = vunpack.i.l.bf16 %v1030_v30  ;;  %v1027_v33 = vunpack.i.h.bf16 %v1025_v29  ;;  %v1026_v34 = vunpack.i.l.bf16 %v1025_v29 }
 0x117   : > { %931 = vmatmul.mubr.msk.bf16.vlgmr.msra.gmra.mrb[0].mxu0 %vm571_vm7, %v532_v28 }
 0x118   : > { %v527_v37 = vsel %vm522_vm6, %v518_v25, %v1031_v32  ;;  %v528_v38 = vsel %vm522_vm6, %v519_v36, %v1032_v31  ;;  %v521_v43 = vsel %vm513_vm5, %v454_v62, %v1027_v33  ;;  %v520_v44 = vsel %vm513_vm5, %v453_v57, %v1026_v34 }
 0x119   : > { %v1035_v35 = vpop.permute.xlu0 %1034  ;;  %v533_v39 = vpack.c.bf16 %v528_v38, %v527_v37 }
 0x11a   : > { %v1037_v40 = vunpack.i.h.bf16 %v1035_v35  ;;  %v1036_v42 = vunpack.i.l.bf16 %v1035_v35 }
 0x11b   : > { %934 = vmatprep.mubr.msk.bf16.mxu1 %vm571_vm7, %v533_v39 }
 0x11c   : > { %v529_v45 = vsel %vm522_vm6, %v520_v44, %v1036_v42  ;;  %v530_v41 = vsel %vm522_vm6, %v521_v43, %v1037_v40 }
 0x11d   : > { %v534_v46 = vpack.c.bf16 %v530_v41, %v529_v45 }
 0x11f   : > { %935 = vmatmul.mubr.msk.bf16.vlgmr.msra.gmra.mrb[0].mxu1 %vm571_vm7, %v534_v46 }
 0x1ea   : > { %v932_v47 = vpop.f32.mrb[0].mxu0 }
 0x1eb   : > { %v886_v48 = vpack.c.bf16 %v932_v47, %v932_v47  ;;  %v622_v49 = vpop.f32.mrb[1].mxu0  ;;  %v678_v53 = vmul.f32 %v932_v47, %v932_v47  ;;  %v656_v62 = vsel %vm438_vm2, %v932_v47, 0.0 }
 0x1ec   : > { %v676_v50 = vmul.f32 %v622_v49, %v622_v49  ;;  %v884_v51 = vpack.c.bf16 %v622_v49, %v622_v49  ;;  %v933_v52 = vpop.f32.mrb[2].mxu0  ;;  %v653_v56 = vsel %vm438_vm2, %v622_v49, 0.0 }
 0x1ed   : > { %741 = vst.msk [vmem:[%s1247_s26 + $0x8] sm:$0xf] %vm738_vm8, %v886_v48  ;;  %v887_v54 = vpack.c.bf16 %v933_v52, %v933_v52  ;;  %v625_v55 = vpop.f32.mrb[3].mxu0  ;;  %v679_v60 = vmul.f32 %v933_v52, %v933_v52  ;;  %v687_v3 = vsel %vm438_vm2, %v678_v53, 0.0  ;;  %v658_v5 = vsel %vm438_vm2, %v933_v52, 0.0 }
 0x1ee   : > { %739 = vst.msk [vmem:[%s1247_s26] sm:$0xf] %vm738_vm8, %v884_v51  ;;  %v654_v57 = vsel %vm438_vm2, %v625_v55, 0.0  ;;  %v677_v58 = vmul.f32 %v625_v55, %v625_v55  ;;  %v885_v59 = vpack.c.bf16 %v625_v55, %v625_v55  ;;  %v684_v63 = vsel %vm438_vm2, %v676_v50, 0.0 }
 0x1ef   : > { %742 = vst.msk [vmem:[%s1247_s26 + $0xc] sm:$0xf] %vm738_vm8, %v887_v54  ;;  %v655_v61 = vadd.f32 %v654_v57, %v653_v56  ;;  %v689_v6 = vsel %vm438_vm2, %v679_v60, 0.0 }
 0x1f0   : > { %v685_v0 = vsel %vm438_vm2, %v677_v58, 0.0  ;;  %740 = vst.msk [vmem:[%s1247_s26 + $0x4] sm:$0xf] %vm738_vm8, %v885_v59 }
 0x1f1   : > { %v657_v1 = vadd.f32 %v656_v62, %v655_v61  ;;  %v686_v2 = vadd.f32 %v685_v0, %v684_v63 }
 0x1f2   : > { %v936_v4 = vpop.f32.mrb[0].mxu1 }
 0x1f3   : > { %v688_v7 = vadd.f32 %v687_v3, %v686_v2  ;;  %v890_v8 = vpack.c.bf16 %v936_v4, %v936_v4  ;;  %v638_v9 = vpop.f32.mrb[1].mxu1  ;;  %v659_v10 = vadd.f32 %v658_v5, %v657_v1  ;;  %v682_v21 = vmul.f32 %v936_v4, %v936_v4 }
 0x1f4   : > { %v660_v11 = vsel %vm438_vm2, %v638_v9, 0.0  ;;  %v680_v12 = vmul.f32 %v638_v9, %v638_v9  ;;  %v888_v13 = vpack.c.bf16 %v638_v9, %v638_v9  ;;  %v937_v14 = vpop.f32.mrb[2].mxu1  ;;  %v664_v27 = vsel %vm438_vm2, %v936_v4, 0.0 }
 0x1f5   : > { %745 = vst.msk [vmem:[%s1247_s26 + $0x18] sm:$0xf] %vm738_vm8, %v890_v8  ;;  %v690_v15 = vadd.f32 %v689_v6, %v688_v7  ;;  %v641_v16 = vpop.f32.mrb[3].mxu1  ;;  %v661_v17 = vadd.f32 %v660_v11, %v659_v10  ;;  %v891_v19 = vpack.c.bf16 %v937_v14, %v937_v14  ;;  %v683_v28 = vmul.f32 %v937_v14, %v937_v14 }
 0x1f6   : > { %v691_v18 = vsel %vm438_vm2, %v680_v12, 0.0  ;;  %743 = vst.msk [vmem:[%s1247_s26 + $0x10] sm:$0xf] %vm738_vm8, %v888_v13  ;;  %v662_v20 = vsel %vm438_vm2, %v641_v16, 0.0  ;;  %v681_v23 = vmul.f32 %v641_v16, %v641_v16  ;;  %v889_v26 = vpack.c.bf16 %v641_v16, %v641_v16 }
 0x1f7   : > { %v692_v22 = vadd.f32 %v691_v18, %v690_v15  ;;  %746 = vst.msk [vmem:[%s1247_s26 + $0x1c] sm:$0xf] %vm738_vm8, %v891_v19  ;;  %v663_v24 = vadd.f32 %v662_v20, %v661_v17  ;;  %v695_v32 = vsel %vm438_vm2, %v682_v21, 0.0  ;;  %v666_v33 = vsel %vm438_vm2, %v937_v14, 0.0 }
 0x1f8   : > { %v693_v29 = vsel %vm438_vm2, %v681_v23, 0.0  ;;  %744 = vst.msk [vmem:[%s1247_s26 + $0x14] sm:$0xf] %vm738_vm8, %v889_v26  ;;  %v697_v36 = vsel %vm438_vm2, %v683_v28, 0.0 }
 0x1f9   : > { %v665_v30 = vadd.f32 %v664_v27, %v663_v24  ;;  %v694_v31 = vadd.f32 %v693_v29, %v692_v22 }
 0x1fb   : > { %v667_v34 = vadd.f32 %v666_v33, %v665_v30  ;;  %v696_v25 = vadd.f32 %v695_v32, %v694_v31 }
 0x1fd   : > { %v668_v37 = vrot.slane %v667_v34, 4  ;;  %v698_v38 = vadd.f32 %v697_v36, %v696_v25 }
 0x1ff   : > { %v669_v35 = vadd.f32 %v668_v37, %v667_v34  ;;  %v699_v39 = vrot.slane %v698_v38, 4 }
 0x201   : > { %v670_v40 = vrot.slane %v669_v35, 2  ;;  %v700_v42 = vadd.f32 %v699_v39, %v698_v38 }
 0x203   : > { %v671_v43 = vadd.f32 %v670_v40, %v669_v35  ;;  %v701_v44 = vrot.slane %v700_v42, 2 }
 0x205   : > { %v672_v45 = vrot.slane %v671_v43, 1  ;;  %v702_v41 = vadd.f32 %v701_v44, %v700_v42 }
 0x207   : > { %v673_v46 = vadd.f32 %v672_v45, %v671_v43  ;;  %v703_v47 = vrot.slane %v702_v41, 1 }
 0x209   : > { %675 = vst.msk [vmem:[%s265_s28] sm:$0x1] %vm674_vm9, %v673_v46  ;;  %v704_v48 = vadd.f32 %v703_v47, %v702_v41 }
 0x20b   : > { %705 = vst.msk [vmem:[%s268_s7] sm:$0x1] %vm674_vm9, %v704_v48 }
 0x20c PF: > { %s17_s21 = sadd.s32 1, %s1049_s21  }
 0x20d   : > { %p14_p4 = scmp.ge.s32.totalorder %s17_s21, 4  }
 0x20f   :  { %16 = sbr.rel (!%p14_p4) target bundleno = 1 (0x1), region = 90 }

</bundles_post_ra>
